<compile_context>
chip_gen: v7x
topology: tpu7x:2x2x1
jax: 0.10.0
libtpu: 0.0.40
codegen_flags: <defaults>
</compile_context>

<pallas_src>
import functools
import math

import jax
import jax.numpy as jnp
from jax import lax
from jax.experimental import pallas as pl
from jax.experimental.pallas import tpu as pltpu

INPUT_SIZE = 19
HIDDEN_SIZE = 64
NUM_LAYERS = 2  # hard-wired to 2 layers in the kernel below


def _round_up(x, m):
    return ((x + m - 1) // m) * m


def _lstm_kernel(x0p_ref,   # (T_CHUNK*B, 4H) f32: x @ W_ih0^T + b0, gate-reordered, dense
                 whh0_ref,  # (H, 4H) layer-0 recurrent weights (matmul dtype)
                 wih1_ref,  # (H, 4H) layer-1 input weights     (matmul dtype)
                 whh1_ref,  # (H, 4H) layer-1 recurrent weights (matmul dtype)
                 b1_ref,    # (1, 4H) layer-1 fused bias (f32)
                 wfc_ref,   # (1, H)  fc weight row (f32)
                 bfc_ref,   # (1, 1)  fc bias (f32)
                 out_ref,   # (B, 1)  f32
                 h0_ref, c0_ref, h1_ref, c1_ref,   # VMEM scratch, persist across chunks
                 *, T, T_CHUNK, G_STEPS, mask_tail, hoist_weights):
    H = whh0_ref.shape[0]
    B = out_ref.shape[0]
    GB = G_STEPS * B            # rows per aligned group load (multiple of 8)
    n_groups = T_CHUNK // G_STEPS
    cdt = whh0_ref.dtype        # bf16 fast path or f32 exact path

    chunk = pl.program_id(0)
    n_chunks = pl.num_programs(0)

    @pl.when(chunk == 0)
    def _init():
        h0_ref[...] = jnp.zeros_like(h0_ref)
        c0_ref[...] = jnp.zeros_like(c0_ref)
        h1_ref[...] = jnp.zeros_like(h1_ref)
        c1_ref[...] = jnp.zeros_like(c1_ref)

    # ---- loop-invariant hoists (JAX does not CSE broadcast_in_dim in loops) ----
    b1 = jnp.broadcast_to(b1_ref[...], (B, 4 * H))
    if hoist_weights:
        w_hoisted = (whh0_ref[...], wih1_ref[...], whh1_ref[...])

    def read_w():
        if hoist_weights:
            return w_hoisted
        return whh0_ref[...], wih1_ref[...], whh1_ref[...]

    chunk_t0 = chunk * T_CHUNK  # global timestep at the start of this chunk

    def gates_to_hc(gates, c):
        # Gate order is [i, f, o, g]: one lane-contiguous sigmoid over 3H lanes,
        # one tanh over the last H lanes.  sigmoid via tanh => single EUP push.
        s = 0.5 * jnp.tanh(0.5 * gates[:, 0:3 * H]) + 0.5
        i = s[:, 0:H]
        f = s[:, H:2 * H]
        o = s[:, 2 * H:3 * H]
        g = jnp.tanh(gates[:, 3 * H:4 * H])
        c_new = f * c + i * g
        h_new = o * jnp.tanh(c_new)
        return h_new, c_new

    def group(j, carry):
        h0, c0, h1, c1 = carry
        # One aligned dynamic load of G_STEPS timesteps (GB rows, multiple of 8).
        row0 = pl.multiple_of(j * GB, 8)
        xg = x0p_ref[pl.ds(row0, GB), :]                  # (GB, 4H) f32
        for s in range(G_STEPS):                          # static partial unroll
            whh0, wih1, whh1 = read_w()
            # Layer 0: input projection + bias were hoisted into x0p; only the
            # recurrent term is computed per step.
            g0 = xg[s * B:(s + 1) * B, :] + jnp.dot(
                h0, whh0, preferred_element_type=jnp.float32)
            h0n, c0n = gates_to_hc(g0, c0)
            h0n = h0n.astype(cdt)                         # cast once, carry in cdt
            # Layer 1: two independent K=H dots (pipeline back-to-back on the MXU).
            g1 = (jnp.dot(h0n, wih1, preferred_element_type=jnp.float32)
                  + jnp.dot(h1, whh1, preferred_element_type=jnp.float32)
                  + b1)
            h1n, c1n = gates_to_hc(g1, c1)
            h1n = h1n.astype(cdt)
            if mask_tail:
                # Only reached when T was padded up to a chunk multiple: padded
                # steps must not advance the state.
                valid = (chunk_t0 + j * G_STEPS + s) < T
                h0 = jnp.where(valid, h0n, h0)
                c0 = jnp.where(valid, c0n, c0)
                h1 = jnp.where(valid, h1n, h1)
                c1 = jnp.where(valid, c1n, c1)
            else:
                h0, c0, h1, c1 = h0n, c0n, h1n, c1n
        return (h0, c0, h1, c1)

    carry0 = (h0_ref[...], c0_ref[...], h1_ref[...], c1_ref[...])
    h0, c0, h1, c1 = lax.fori_loop(0, n_groups, group, carry0,
                                   unroll=(n_groups <= 8))
    h0_ref[...] = h0
    c0_ref[...] = c0
    h1_ref[...] = h1
    c1_ref[...] = c1

    @pl.when(chunk == n_chunks - 1)
    def _finalize():
        # FC head (H -> 1) as VPU multiply + lane reduction (no 1-column matmul).
        h1f = h1.astype(jnp.float32)
        out_ref[...] = (jnp.sum(h1f * wfc_ref[...], axis=-1, keepdims=True)
                        + bfc_ref[...])


def energy_price_lstm_forward(x, params, *, matmul_dtype=jnp.bfloat16, t_chunk=256):
    """x: (B, T, INPUT_SIZE) float32 (batch_first, like nn.LSTM(batch_first=True)).

    Returns shape (B,) for B>1 and a scalar for B==1 — matching
    `self.fc(lstm_out[:, -1, :]).squeeze()`.

    matmul_dtype controls only the MXU operand dtype (and the carried h dtype);
    cell state / nonlinearities stay float32.  NOTE: in the bf16 path the
    hidden-state quantization error compounds with T; validate at your target
    sequence length or use matmul_dtype=float32.
    """
    B, T, F = x.shape
    H = HIDDEN_SIZE
    if T < 1:
        raise ValueError("sequence length must be >= 1")

    # Group size so each group's rows (G_STEPS*B) are sublane (8) aligned.
    G_STEPS = 8 // math.gcd(B, 8)
    # Time chunk: single chunk for short sequences, else ~t_chunk steps per
    # grid iteration (each streamed buffer stays ~<=1 MiB; overlapped with the
    # recurrence by the BlockSpec pipeline, well under every chip's VMEM).
    if T <= t_chunk:
        T_CHUNK = _round_up(T, G_STEPS)
    else:
        T_CHUNK = _round_up(t_chunk, G_STEPS)
    T_pad = _round_up(T, T_CHUNK)
    num_chunks = T_pad // T_CHUNK
    mask_tail = (T_pad != T)
    hoist_weights = jnp.dtype(matmul_dtype).itemsize < 4

    # Reorder PyTorch gate blocks [i, f, g, o] -> [i, f, o, g] so all sigmoid
    # gates are lane-contiguous inside the kernel.
    perm = jnp.concatenate([jnp.arange(0, 2 * H),
                            jnp.arange(3 * H, 4 * H),
                            jnp.arange(2 * H, 3 * H)])

    w_ih0 = params["w_ih0"][perm]                              # (4H, F)
    b0 = (params["b_ih0"] + params["b_hh0"])[perm]             # (4H,)
    whh0 = params["w_hh0"][perm].T.astype(matmul_dtype)        # (H, 4H)
    wih1 = params["w_ih1"][perm].T.astype(matmul_dtype)        # (H, 4H)
    whh1 = params["w_hh1"][perm].T.astype(matmul_dtype)        # (H, 4H)
    b1 = (params["b_ih1"] + params["b_hh1"])[perm].reshape(1, 4 * H).astype(jnp.float32)
    wfc = params["w_fc"].reshape(1, H).astype(jnp.float32)     # (1, H)
    bfc = params["b_fc"].reshape(1, 1).astype(jnp.float32)     # (1, 1)

    # Hoist the time-invariant layer-0 input projection out of the recurrence:
    # one (T*B, F) @ (F, 4H) matmul done by XLA at full precision, bias folded.
    x_tbf = jnp.transpose(x, (1, 0, 2)).astype(jnp.float32)    # (T, B, F)
    x0p = jnp.einsum("tbf,gf->tbg", x_tbf, w_ih0,
                     precision=lax.Precision.HIGHEST,
                     preferred_element_type=jnp.float32) + b0  # (T, B, 4H)
    if T_pad != T:
        x0p = jnp.pad(x0p, ((0, T_pad - T), (0, 0), (0, 0)))
    # Dense, padding-free layout for streaming: row t*B+b holds timestep t.
    x0p_flat = x0p.reshape(T_pad * B, 4 * H)

    kernel = functools.partial(
        _lstm_kernel, T=T, T_CHUNK=T_CHUNK, G_STEPS=G_STEPS,
        mask_tail=mask_tail, hoist_weights=hoist_weights)

    out = pl.pallas_call(
        kernel,
        out_shape=jax.ShapeDtypeStruct((B, 1), jnp.float32),
        grid_spec=pltpu.PrefetchScalarGridSpec(
            num_scalar_prefetch=0,
            grid=(num_chunks,),
            in_specs=[
                # Streamed O(T) activations: one chunk per grid step.
                pl.BlockSpec((T_CHUNK * B, 4 * H), lambda c: (c, 0)),
                # Weights / biases: constant block index => VMEM-resident, no re-DMA.
                pl.BlockSpec((H, 4 * H), lambda c: (0, 0)),
                pl.BlockSpec((H, 4 * H), lambda c: (0, 0)),
                pl.BlockSpec((H, 4 * H), lambda c: (0, 0)),
                pl.BlockSpec((1, 4 * H), lambda c: (0, 0)),
                pl.BlockSpec((1, H), lambda c: (0, 0)),
                pl.BlockSpec((1, 1), lambda c: (0, 0)),
            ],
            out_specs=pl.BlockSpec((B, 1), lambda c: (0, 0)),
            scratch_shapes=[
                pltpu.VMEM((B, H), matmul_dtype),   # h0 (carried in matmul dtype)
                pltpu.VMEM((B, H), jnp.float32),    # c0
                pltpu.VMEM((B, H), matmul_dtype),   # h1
                pltpu.VMEM((B, H), jnp.float32),    # c1
            ]),
        compiler_params=pltpu.CompilerParams(
            # The time-chunk axis carries state through scratch => sequential.
            dimension_semantics=("arbitrary",)),
    )(x0p_flat, whh0, wih1, whh1, b1, wfc, bfc)

    # torch .squeeze(): scalar for B==1, (B,) otherwise.
    return out[0, 0] if B == 1 else out[:, 0]


def init_params(key, input_size=INPUT_SIZE, hidden_size=HIDDEN_SIZE):
    """Deterministic synthetic parameters with nn.LSTM / nn.Linear shapes."""
    H = hidden_size
    ks = jax.random.split(key, 10)
    scale = 1.0 / jnp.sqrt(jnp.float32(H))
    u = lambda k, shape: jax.random.uniform(k, shape, jnp.float32, -scale, scale)
    return {
        "w_ih0": u(ks[0], (4 * H, input_size)),
        "w_hh0": u(ks[1], (4 * H, H)),
        "b_ih0": u(ks[2], (4 * H,)),
        "b_hh0": u(ks[3], (4 * H,)),
        "w_ih1": u(ks[4], (4 * H, H)),
        "w_hh1": u(ks[5], (4 * H, H)),
        "b_ih1": u(ks[6], (4 * H,)),
        "b_hh1": u(ks[7], (4 * H,)),
        "w_fc": u(ks[8], (1, H)),
        "b_fc": u(ks[9], (1,)),
    }


def _reference_forward(x, params):
    """Pure-JAX reference (same math as nn.LSTM + nn.Linear) for sanity check."""
    B, T, F = x.shape
    H = HIDDEN_SIZE
    hi = lax.Precision.HIGHEST

    def cell(x_in, h, c, w_ih, w_hh, b_ih, b_hh):
        gates = (jnp.dot(x_in, w_ih.T, precision=hi)
                 + jnp.dot(h, w_hh.T, precision=hi) + b_ih + b_hh)
        i = jax.nn.sigmoid(gates[:, 0:H])
        f = jax.nn.sigmoid(gates[:, H:2 * H])
        g = jnp.tanh(gates[:, 2 * H:3 * H])
        o = jax.nn.sigmoid(gates[:, 3 * H:4 * H])
        c_new = f * c + i * g
        return o * jnp.tanh(c_new), c_new

    def step(carry, x_t):
        h0, c0, h1, c1 = carry
        h0, c0 = cell(x_t, h0, c0, params["w_ih0"], params["w_hh0"],
                      params["b_ih0"], params["b_hh0"])
        h1, c1 = cell(h0, h1, c1, params["w_ih1"], params["w_hh1"],
                      params["b_ih1"], params["b_hh1"])
        return (h0, c0, h1, c1), None

    z = jnp.zeros((B, H), jnp.float32)
    (h0, c0, h1, c1), _ = lax.scan(step, (z, z, z, z),
                                   jnp.transpose(x, (1, 0, 2)))
    out = h1 @ params["w_fc"].T + params["b_fc"]
    return out[:, 0]


if __name__ == "__main__":
    key = jax.random.PRNGKey(0)
    k_x, k_p, k_x2 = jax.random.split(key, 3)
    params = init_params(k_p)

    # --- Small shape (B=2, T=8): single-chunk path, both precision modes. ---
    B, T = 2, 8
    x = jax.random.normal(k_x, (B, T, INPUT_SIZE), jnp.float32)
    ref = jax.block_until_ready(_reference_forward(x, params))

    fwd_f32 = jax.jit(functools.partial(energy_price_lstm_forward,
                                        matmul_dtype=jnp.float32))
    out_f32 = jax.block_until_ready(fwd_f32(x, params))
    assert out_f32.shape == (B,)
    assert jnp.allclose(out_f32, ref, atol=1e-4, rtol=1e-4), (out_f32, ref)

    fwd_bf16 = jax.jit(functools.partial(energy_price_lstm_forward,
                                         matmul_dtype=jnp.bfloat16))
    out_bf16 = jax.block_until_ready(fwd_bf16(x, params))
    assert out_bf16.shape == (B,)
    assert jnp.allclose(out_bf16, ref, atol=5e-2, rtol=5e-2), (out_bf16, ref)

    # --- Longer sequence: exercises streamed multi-chunk grid + tail masking. ---
    T2 = 300
    x2 = jax.random.normal(k_x2, (B, T2, INPUT_SIZE), jnp.float32)
    ref2 = jax.block_until_ready(_reference_forward(x2, params))
    fwd_stream = jax.jit(functools.partial(energy_price_lstm_forward,
                                           matmul_dtype=jnp.float32, t_chunk=128))
    out2 = jax.block_until_ready(fwd_stream(x2, params))   # 3 chunks, padded tail
    assert out2.shape == (B,)
    assert jnp.allclose(out2, ref2, atol=5e-3, rtol=5e-3), (out2, ref2)

    print("KERNEL_OK")
</pallas_src>

<mosaic_0001>
module attributes {stable_mosaic.version = 11 : i64} {
  func.func @_lstm_kernel(%arg0: i32, %arg1: memref<16x256xf32, #tpu.memory_space<vmem>>, %arg2: memref<64x256xf32, #tpu.memory_space<vmem>>, %arg3: memref<64x256xf32, #tpu.memory_space<vmem>>, %arg4: memref<64x256xf32, #tpu.memory_space<vmem>>, %arg5: memref<1x256xf32, #tpu.memory_space<vmem>>, %arg6: memref<1x64xf32, #tpu.memory_space<vmem>>, %arg7: memref<1x1xf32, #tpu.memory_space<vmem>>, %arg8: memref<2x1xf32, #tpu.memory_space<vmem>>, %arg9: memref<2x64xf32, #tpu.memory_space<vmem>>, %arg10: memref<2x64xf32, #tpu.memory_space<vmem>>, %arg11: memref<2x64xf32, #tpu.memory_space<vmem>>, %arg12: memref<2x64xf32, #tpu.memory_space<vmem>>) attributes {dimension_semantics = [#tpu.dimension_semantics<arbitrary>], iteration_bounds = array<i64: 1>, scalar_prefetch = 0 : i64, scratch_operands = 4 : i64, tpu.core_type = #tpu.core_type<tc>, window_params = [{transform_indices = @transform_0, window_bounds = array<i64: 16, 256>}, {pipeline_mode = #tpu.pipeline_mode<synchronous>, transform_indices = @transform_1, window_bounds = array<i64: 64, 256>}, {pipeline_mode = #tpu.pipeline_mode<synchronous>, transform_indices = @transform_2, window_bounds = array<i64: 64, 256>}, {pipeline_mode = #tpu.pipeline_mode<synchronous>, transform_indices = @transform_3, window_bounds = array<i64: 64, 256>}, {pipeline_mode = #tpu.pipeline_mode<synchronous>, transform_indices = @transform_4, window_bounds = array<i64: 1, 256>}, {pipeline_mode = #tpu.pipeline_mode<synchronous>, transform_indices = @transform_5, window_bounds = array<i64: 1, 64>}, {pipeline_mode = #tpu.pipeline_mode<synchronous>, transform_indices = @transform_6, window_bounds = array<i64: 1, 1>}, {pipeline_mode = #tpu.pipeline_mode<synchronous>, transform_indices = @transform_7, window_bounds = array<i64: 2, 1>}]} {
    %c0_i32 = arith.constant 0 : i32
    %0 = arith.cmpi eq, %arg0, %c0_i32 : i32
    %1 = arith.extui %0 : i1 to i32
    %c0_i32_0 = arith.constant 0 : i32
    %2 = arith.cmpi ne, %1, %c0_i32_0 : i32
    scf.if %2 {
      %cst_143 = arith.constant 0.000000e+00 : f32
      %393 = vector.broadcast %cst_143 : f32 to vector<2x64xf32>
      %c0_144 = arith.constant 0 : index
      %c0_145 = arith.constant 0 : index
      %394 = vector.load %arg9[%c0_144, %c0_145] : memref<2x64xf32, #tpu.memory_space<vmem>>, vector<2x64xf32>
      tpu.vector_store %arg9[%c0_144, %c0_145], %393 {strides = array<i32>} : memref<2x64xf32, #tpu.memory_space<vmem>>, vector<2x64xf32>,
      %cst_146 = arith.constant 0.000000e+00 : f32
      %395 = vector.broadcast %cst_146 : f32 to vector<2x64xf32>
      %c0_147 = arith.constant 0 : index
      %c0_148 = arith.constant 0 : index
      %396 = vector.load %arg10[%c0_147, %c0_148] : memref<2x64xf32, #tpu.memory_space<vmem>>, vector<2x64xf32>
      tpu.vector_store %arg10[%c0_147, %c0_148], %395 {strides = array<i32>} : memref<2x64xf32, #tpu.memory_space<vmem>>, vector<2x64xf32>,
      %cst_149 = arith.constant 0.000000e+00 : f32
      %397 = vector.broadcast %cst_149 : f32 to vector<2x64xf32>
      %c0_150 = arith.constant 0 : index
      %c0_151 = arith.constant 0 : index
      %398 = vector.load %arg11[%c0_150, %c0_151] : memref<2x64xf32, #tpu.memory_space<vmem>>, vector<2x64xf32>
      tpu.vector_store %arg11[%c0_150, %c0_151], %397 {strides = array<i32>} : memref<2x64xf32, #tpu.memory_space<vmem>>, vector<2x64xf32>,
      %cst_152 = arith.constant 0.000000e+00 : f32
      %399 = vector.broadcast %cst_152 : f32 to vector<2x64xf32>
      %c0_153 = arith.constant 0 : index
      %c0_154 = arith.constant 0 : index
      %400 = vector.load %arg12[%c0_153, %c0_154] : memref<2x64xf32, #tpu.memory_space<vmem>>, vector<2x64xf32>
      tpu.vector_store %arg12[%c0_153, %c0_154], %399 {strides = array<i32>} : memref<2x64xf32, #tpu.memory_space<vmem>>, vector<2x64xf32>,
    } else {
    }
    %c0 = arith.constant 0 : index
    %c0_1 = arith.constant 0 : index
    %3 = vector.load %arg5[%c0, %c0_1] : memref<1x256xf32, #tpu.memory_space<vmem>>, vector<1x256xf32>
    %4 = vector.shape_cast %3 : vector<1x256xf32> to vector<1x256xf32>
    %5 = vector.broadcast %4 : vector<1x256xf32> to vector<2x256xf32>
    %c0_2 = arith.constant 0 : index
    %c0_3 = arith.constant 0 : index
    %6 = vector.load %arg9[%c0_2, %c0_3] : memref<2x64xf32, #tpu.memory_space<vmem>>, vector<2x64xf32>
    %c0_4 = arith.constant 0 : index
    %c0_5 = arith.constant 0 : index
    %7 = vector.load %arg10[%c0_4, %c0_5] : memref<2x64xf32, #tpu.memory_space<vmem>>, vector<2x64xf32>
    %c0_6 = arith.constant 0 : index
    %c0_7 = arith.constant 0 : index
    %8 = vector.load %arg11[%c0_6, %c0_7] : memref<2x64xf32, #tpu.memory_space<vmem>>, vector<2x64xf32>
    %c0_8 = arith.constant 0 : index
    %c0_9 = arith.constant 0 : index
    %9 = vector.load %arg12[%c0_8, %c0_9] : memref<2x64xf32, #tpu.memory_space<vmem>>, vector<2x64xf32>
    %c0_i32_10 = arith.constant 0 : i32
    %c8_i32 = arith.constant 8 : i32
    %10 = arith.muli %c0_i32_10, %c8_i32 : i32
    %11 = tpu.assume_multiple %10, 8 : i32
    %12 = arith.index_cast %11 : i32 to index
    %c0_11 = arith.constant 0 : index
    %13 = vector.load %arg1[%12, %c0_11] : memref<16x256xf32, #tpu.memory_space<vmem>>, vector<8x256xf32>
    %c0_12 = arith.constant 0 : index
    %c0_13 = arith.constant 0 : index
    %14 = vector.load %arg2[%c0_12, %c0_13] : memref<64x256xf32, #tpu.memory_space<vmem>>, vector<64x256xf32>
    %c0_14 = arith.constant 0 : index
    %c0_15 = arith.constant 0 : index
    %15 = vector.load %arg3[%c0_14, %c0_15] : memref<64x256xf32, #tpu.memory_space<vmem>>, vector<64x256xf32>
    %c0_16 = arith.constant 0 : index
    %c0_17 = arith.constant 0 : index
    %16 = vector.load %arg4[%c0_16, %c0_17] : memref<64x256xf32, #tpu.memory_space<vmem>>, vector<64x256xf32>
    %17 = vector.extract_strided_slice %13 {offsets = [0, 0], sizes = [2, 256], strides = [1, 1]} : vector<8x256xf32> to vector<2x256xf32>
    %cst = arith.constant dense<0.000000e+00> : vector<2x256xf32>
    %18 = tpu.matmul %6, %14, %cst {dimension_numbers = #tpu.dot_dimension_numbers<[1], [0], [0], [1], [0, 0, 1, 1], [], []>} : vector<2x64xf32>, vector<64x256xf32>, vector<2x256xf32> -> vector<2x256xf32>
    %19 = arith.addf %17, %18 : vector<2x256xf32>
    %20 = vector.extract_strided_slice %19 {offsets = [0, 0], sizes = [2, 192], strides = [1, 1]} : vector<2x256xf32> to vector<2x192xf32>
    %cst_18 = arith.constant 5.000000e-01 : f32
    %21 = vector.broadcast %cst_18 : f32 to vector<2x192xf32>
    %22 = arith.mulf %21, %20 : vector<2x192xf32>
    %23 = math.tanh %22 : vector<2x192xf32>
    %cst_19 = arith.constant 5.000000e-01 : f32
    %24 = vector.broadcast %cst_19 : f32 to vector<2x192xf32>
    %25 = arith.mulf %24, %23 : vector<2x192xf32>
    %cst_20 = arith.constant 5.000000e-01 : f32
    %26 = vector.broadcast %cst_20 : f32 to vector<2x192xf32>
    %27 = arith.addf %25, %26 : vector<2x192xf32>
    %28 = vector.extract_strided_slice %27 {offsets = [0, 0], sizes = [2, 64], strides = [1, 1]} : vector<2x192xf32> to vector<2x64xf32>
    %29 = vector.extract_strided_slice %27 {offsets = [0, 64], sizes = [2, 64], strides = [1, 1]} : vector<2x192xf32> to vector<2x64xf32>
    %30 = vector.extract_strided_slice %27 {offsets = [0, 128], sizes = [2, 64], strides = [1, 1]} : vector<2x192xf32> to vector<2x64xf32>
    %31 = vector.extract_strided_slice %19 {offsets = [0, 192], sizes = [2, 64], strides = [1, 1]} : vector<2x256xf32> to vector<2x64xf32>
    %32 = math.tanh %31 : vector<2x64xf32>
    %33 = arith.mulf %29, %7 : vector<2x64xf32>
    %34 = arith.mulf %28, %32 : vector<2x64xf32>
    %35 = arith.addf %33, %34 : vector<2x64xf32>
    %36 = math.tanh %35 : vector<2x64xf32>
    %37 = arith.mulf %30, %36 : vector<2x64xf32>
    %cst_21 = arith.constant dense<0.000000e+00> : vector<2x256xf32>
    %38 = tpu.matmul %37, %15, %cst_21 {dimension_numbers = #tpu.dot_dimension_numbers<[1], [0], [0], [1], [0, 0, 1, 1], [], []>} : vector<2x64xf32>, vector<64x256xf32>, vector<2x256xf32> -> vector<2x256xf32>
    %cst_22 = arith.constant dense<0.000000e+00> : vector<2x256xf32>
    %39 = tpu.matmul %8, %16, %cst_22 {dimension_numbers = #tpu.dot_dimension_numbers<[1], [0], [0], [1], [0, 0, 1, 1], [], []>} : vector<2x64xf32>, vector<64x256xf32>, vector<2x256xf32> -> vector<2x256xf32>
    %40 = arith.addf %38, %39 : vector<2x256xf32>
    %41 = arith.addf %40, %5 : vector<2x256xf32>
    %42 = vector.extract_strided_slice %41 {offsets = [0, 0], sizes = [2, 192], strides = [1, 1]} : vector<2x256xf32> to vector<2x192xf32>
    %cst_23 = arith.constant 5.000000e-01 : f32
    %43 = vector.broadcast %cst_23 : f32 to vector<2x192xf32>
    %44 = arith.mulf %43, %42 : vector<2x192xf32>
    %45 = math.tanh %44 : vector<2x192xf32>
    %cst_24 = arith.constant 5.000000e-01 : f32
    %46 = vector.broadcast %cst_24 : f32 to vector<2x192xf32>
    %47 = arith.mulf %46, %45 : vector<2x192xf32>
    %cst_25 = arith.constant 5.000000e-01 : f32
    %48 = vector.broadcast %cst_25 : f32 to vector<2x192xf32>
    %49 = arith.addf %47, %48 : vector<2x192xf32>
    %50 = vector.extract_strided_slice %49 {offsets = [0, 0], sizes = [2, 64], strides = [1, 1]} : vector<2x192xf32> to vector<2x64xf32>
    %51 = vector.extract_strided_slice %49 {offsets = [0, 64], sizes = [2, 64], strides = [1, 1]} : vector<2x192xf32> to vector<2x64xf32>
    %52 = vector.extract_strided_slice %49 {offsets = [0, 128], sizes = [2, 64], strides = [1, 1]} : vector<2x192xf32> to vector<2x64xf32>
    %53 = vector.extract_strided_slice %41 {offsets = [0, 192], sizes = [2, 64], strides = [1, 1]} : vector<2x256xf32> to vector<2x64xf32>
    %54 = math.tanh %53 : vector<2x64xf32>
    %55 = arith.mulf %51, %9 : vector<2x64xf32>
    %56 = arith.mulf %50, %54 : vector<2x64xf32>
    %57 = arith.addf %55, %56 : vector<2x64xf32>
    %58 = math.tanh %57 : vector<2x64xf32>
    %59 = arith.mulf %52, %58 : vector<2x64xf32>
    %c0_26 = arith.constant 0 : index
    %c0_27 = arith.constant 0 : index
    %60 = vector.load %arg2[%c0_26, %c0_27] : memref<64x256xf32, #tpu.memory_space<vmem>>, vector<64x256xf32>
    %c0_28 = arith.constant 0 : index
    %c0_29 = arith.constant 0 : index
    %61 = vector.load %arg3[%c0_28, %c0_29] : memref<64x256xf32, #tpu.memory_space<vmem>>, vector<64x256xf32>
    %c0_30 = arith.constant 0 : index
    %c0_31 = arith.constant 0 : index
    %62 = vector.load %arg4[%c0_30, %c0_31] : memref<64x256xf32, #tpu.memory_space<vmem>>, vector<64x256xf32>
    %63 = vector.extract_strided_slice %13 {offsets = [2, 0], sizes = [2, 256], strides = [1, 1]} : vector<8x256xf32> to vector<2x256xf32>
    %cst_32 = arith.constant dense<0.000000e+00> : vector<2x256xf32>
    %64 = tpu.matmul %37, %60, %cst_32 {dimension_numbers = #tpu.dot_dimension_numbers<[1], [0], [0], [1], [0, 0, 1, 1], [], []>} : vector<2x64xf32>, vector<64x256xf32>, vector<2x256xf32> -> vector<2x256xf32>
    %65 = arith.addf %63, %64 : vector<2x256xf32>
    %66 = vector.extract_strided_slice %65 {offsets = [0, 0], sizes = [2, 192], strides = [1, 1]} : vector<2x256xf32> to vector<2x192xf32>
    %cst_33 = arith.constant 5.000000e-01 : f32
    %67 = vector.broadcast %cst_33 : f32 to vector<2x192xf32>
    %68 = arith.mulf %67, %66 : vector<2x192xf32>
    %69 = math.tanh %68 : vector<2x192xf32>
    %cst_34 = arith.constant 5.000000e-01 : f32
    %70 = vector.broadcast %cst_34 : f32 to vector<2x192xf32>
    %71 = arith.mulf %70, %69 : vector<2x192xf32>
    %cst_35 = arith.constant 5.000000e-01 : f32
    %72 = vector.broadcast %cst_35 : f32 to vector<2x192xf32>
    %73 = arith.addf %71, %72 : vector<2x192xf32>
    %74 = vector.extract_strided_slice %73 {offsets = [0, 0], sizes = [2, 64], strides = [1, 1]} : vector<2x192xf32> to vector<2x64xf32>
    %75 = vector.extract_strided_slice %73 {offsets = [0, 64], sizes = [2, 64], strides = [1, 1]} : vector<2x192xf32> to vector<2x64xf32>
    %76 = vector.extract_strided_slice %73 {offsets = [0, 128], sizes = [2, 64], strides = [1, 1]} : vector<2x192xf32> to vector<2x64xf32>
    %77 = vector.extract_strided_slice %65 {offsets = [0, 192], sizes = [2, 64], strides = [1, 1]} : vector<2x256xf32> to vector<2x64xf32>
    %78 = math.tanh %77 : vector<2x64xf32>
    %79 = arith.mulf %75, %35 : vector<2x64xf32>
    %80 = arith.mulf %74, %78 : vector<2x64xf32>
    %81 = arith.addf %79, %80 : vector<2x64xf32>
    %82 = math.tanh %81 : vector<2x64xf32>
    %83 = arith.mulf %76, %82 : vector<2x64xf32>
    %cst_36 = arith.constant dense<0.000000e+00> : vector<2x256xf32>
    %84 = tpu.matmul %83, %61, %cst_36 {dimension_numbers = #tpu.dot_dimension_numbers<[1], [0], [0], [1], [0, 0, 1, 1], [], []>} : vector<2x64xf32>, vector<64x256xf32>, vector<2x256xf32> -> vector<2x256xf32>
    %cst_37 = arith.constant dense<0.000000e+00> : vector<2x256xf32>
    %85 = tpu.matmul %59, %62, %cst_37 {dimension_numbers = #tpu.dot_dimension_numbers<[1], [0], [0], [1], [0, 0, 1, 1], [], []>} : vector<2x64xf32>, vector<64x256xf32>, vector<2x256xf32> -> vector<2x256xf32>
    %86 = arith.addf %84, %85 : vector<2x256xf32>
    %87 = arith.addf %86, %5 : vector<2x256xf32>
    %88 = vector.extract_strided_slice %87 {offsets = [0, 0], sizes = [2, 192], strides = [1, 1]} : vector<2x256xf32> to vector<2x192xf32>
    %cst_38 = arith.constant 5.000000e-01 : f32
    %89 = vector.broadcast %cst_38 : f32 to vector<2x192xf32>
    %90 = arith.mulf %89, %88 : vector<2x192xf32>
    %91 = math.tanh %90 : vector<2x192xf32>
    %cst_39 = arith.constant 5.000000e-01 : f32
    %92 = vector.broadcast %cst_39 : f32 to vector<2x192xf32>
    %93 = arith.mulf %92, %91 : vector<2x192xf32>
    %cst_40 = arith.constant 5.000000e-01 : f32
    %94 = vector.broadcast %cst_40 : f32 to vector<2x192xf32>
    %95 = arith.addf %93, %94 : vector<2x192xf32>
    %96 = vector.extract_strided_slice %95 {offsets = [0, 0], sizes = [2, 64], strides = [1, 1]} : vector<2x192xf32> to vector<2x64xf32>
    %97 = vector.extract_strided_slice %95 {offsets = [0, 64], sizes = [2, 64], strides = [1, 1]} : vector<2x192xf32> to vector<2x64xf32>
    %98 = vector.extract_strided_slice %95 {offsets = [0, 128], sizes = [2, 64], strides = [1, 1]} : vector<2x192xf32> to vector<2x64xf32>
    %99 = vector.extract_strided_slice %87 {offsets = [0, 192], sizes = [2, 64], strides = [1, 1]} : vector<2x256xf32> to vector<2x64xf32>
    %100 = math.tanh %99 : vector<2x64xf32>
    %101 = arith.mulf %97, %57 : vector<2x64xf32>
    %102 = arith.mulf %96, %100 : vector<2x64xf32>
    %103 = arith.addf %101, %102 : vector<2x64xf32>
    %104 = math.tanh %103 : vector<2x64xf32>
    %105 = arith.mulf %98, %104 : vector<2x64xf32>
    %c0_41 = arith.constant 0 : index
    %c0_42 = arith.constant 0 : index
    %106 = vector.load %arg2[%c0_41, %c0_42] : memref<64x256xf32, #tpu.memory_space<vmem>>, vector<64x256xf32>
    %c0_43 = arith.constant 0 : index
    %c0_44 = arith.constant 0 : index
    %107 = vector.load %arg3[%c0_43, %c0_44] : memref<64x256xf32, #tpu.memory_space<vmem>>, vector<64x256xf32>
    %c0_45 = arith.constant 0 : index
    %c0_46 = arith.constant 0 : index
    %108 = vector.load %arg4[%c0_45, %c0_46] : memref<64x256xf32, #tpu.memory_space<vmem>>, vector<64x256xf32>
    %109 = vector.extract_strided_slice %13 {offsets = [4, 0], sizes = [2, 256], strides = [1, 1]} : vector<8x256xf32> to vector<2x256xf32>
    %cst_47 = arith.constant dense<0.000000e+00> : vector<2x256xf32>
    %110 = tpu.matmul %83, %106, %cst_47 {dimension_numbers = #tpu.dot_dimension_numbers<[1], [0], [0], [1], [0, 0, 1, 1], [], []>} : vector<2x64xf32>, vector<64x256xf32>, vector<2x256xf32> -> vector<2x256xf32>
    %111 = arith.addf %109, %110 : vector<2x256xf32>
    %112 = vector.extract_strided_slice %111 {offsets = [0, 0], sizes = [2, 192], strides = [1, 1]} : vector<2x256xf32> to vector<2x192xf32>
    %cst_48 = arith.constant 5.000000e-01 : f32
    %113 = vector.broadcast %cst_48 : f32 to vector<2x192xf32>
    %114 = arith.mulf %113, %112 : vector<2x192xf32>
    %115 = math.tanh %114 : vector<2x192xf32>
    %cst_49 = arith.constant 5.000000e-01 : f32
    %116 = vector.broadcast %cst_49 : f32 to vector<2x192xf32>
    %117 = arith.mulf %116, %115 : vector<2x192xf32>
    %cst_50 = arith.constant 5.000000e-01 : f32
    %118 = vector.broadcast %cst_50 : f32 to vector<2x192xf32>
    %119 = arith.addf %117, %118 : vector<2x192xf32>
    %120 = vector.extract_strided_slice %119 {offsets = [0, 0], sizes = [2, 64], strides = [1, 1]} : vector<2x192xf32> to vector<2x64xf32>
    %121 = vector.extract_strided_slice %119 {offsets = [0, 64], sizes = [2, 64], strides = [1, 1]} : vector<2x192xf32> to vector<2x64xf32>
    %122 = vector.extract_strided_slice %119 {offsets = [0, 128], sizes = [2, 64], strides = [1, 1]} : vector<2x192xf32> to vector<2x64xf32>
    %123 = vector.extract_strided_slice %111 {offsets = [0, 192], sizes = [2, 64], strides = [1, 1]} : vector<2x256xf32> to vector<2x64xf32>
    %124 = math.tanh %123 : vector<2x64xf32>
    %125 = arith.mulf %121, %81 : vector<2x64xf32>
    %126 = arith.mulf %120, %124 : vector<2x64xf32>
    %127 = arith.addf %125, %126 : vector<2x64xf32>
    %128 = math.tanh %127 : vector<2x64xf32>
    %129 = arith.mulf %122, %128 : vector<2x64xf32>
    %cst_51 = arith.constant dense<0.000000e+00> : vector<2x256xf32>
    %130 = tpu.matmul %129, %107, %cst_51 {dimension_numbers = #tpu.dot_dimension_numbers<[1], [0], [0], [1], [0, 0, 1, 1], [], []>} : vector<2x64xf32>, vector<64x256xf32>, vector<2x256xf32> -> vector<2x256xf32>
    %cst_52 = arith.constant dense<0.000000e+00> : vector<2x256xf32>
    %131 = tpu.matmul %105, %108, %cst_52 {dimension_numbers = #tpu.dot_dimension_numbers<[1], [0], [0], [1], [0, 0, 1, 1], [], []>} : vector<2x64xf32>, vector<64x256xf32>, vector<2x256xf32> -> vector<2x256xf32>
    %132 = arith.addf %130, %131 : vector<2x256xf32>
    %133 = arith.addf %132, %5 : vector<2x256xf32>
    %134 = vector.extract_strided_slice %133 {offsets = [0, 0], sizes = [2, 192], strides = [1, 1]} : vector<2x256xf32> to vector<2x192xf32>
    %cst_53 = arith.constant 5.000000e-01 : f32
    %135 = vector.broadcast %cst_53 : f32 to vector<2x192xf32>
    %136 = arith.mulf %135, %134 : vector<2x192xf32>
    %137 = math.tanh %136 : vector<2x192xf32>
    %cst_54 = arith.constant 5.000000e-01 : f32
    %138 = vector.broadcast %cst_54 : f32 to vector<2x192xf32>
    %139 = arith.mulf %138, %137 : vector<2x192xf32>
    %cst_55 = arith.constant 5.000000e-01 : f32
    %140 = vector.broadcast %cst_55 : f32 to vector<2x192xf32>
    %141 = arith.addf %139, %140 : vector<2x192xf32>
    %142 = vector.extract_strided_slice %141 {offsets = [0, 0], sizes = [2, 64], strides = [1, 1]} : vector<2x192xf32> to vector<2x64xf32>
    %143 = vector.extract_strided_slice %141 {offsets = [0, 64], sizes = [2, 64], strides = [1, 1]} : vector<2x192xf32> to vector<2x64xf32>
    %144 = vector.extract_strided_slice %141 {offsets = [0, 128], sizes = [2, 64], strides = [1, 1]} : vector<2x192xf32> to vector<2x64xf32>
    %145 = vector.extract_strided_slice %133 {offsets = [0, 192], sizes = [2, 64], strides = [1, 1]} : vector<2x256xf32> to vector<2x64xf32>
    %146 = math.tanh %145 : vector<2x64xf32>
    %147 = arith.mulf %143, %103 : vector<2x64xf32>
    %148 = arith.mulf %142, %146 : vector<2x64xf32>
    %149 = arith.addf %147, %148 : vector<2x64xf32>
    %150 = math.tanh %149 : vector<2x64xf32>
    %151 = arith.mulf %144, %150 : vector<2x64xf32>
    %c0_56 = arith.constant 0 : index
    %c0_57 = arith.constant 0 : index
    %152 = vector.load %arg2[%c0_56, %c0_57] : memref<64x256xf32, #tpu.memory_space<vmem>>, vector<64x256xf32>
    %c0_58 = arith.constant 0 : index
    %c0_59 = arith.constant 0 : index
    %153 = vector.load %arg3[%c0_58, %c0_59] : memref<64x256xf32, #tpu.memory_space<vmem>>, vector<64x256xf32>
    %c0_60 = arith.constant 0 : index
    %c0_61 = arith.constant 0 : index
    %154 = vector.load %arg4[%c0_60, %c0_61] : memref<64x256xf32, #tpu.memory_space<vmem>>, vector<64x256xf32>
    %155 = vector.extract_strided_slice %13 {offsets = [6, 0], sizes = [2, 256], strides = [1, 1]} : vector<8x256xf32> to vector<2x256xf32>
    %cst_62 = arith.constant dense<0.000000e+00> : vector<2x256xf32>
    %156 = tpu.matmul %129, %152, %cst_62 {dimension_numbers = #tpu.dot_dimension_numbers<[1], [0], [0], [1], [0, 0, 1, 1], [], []>} : vector<2x64xf32>, vector<64x256xf32>, vector<2x256xf32> -> vector<2x256xf32>
    %157 = arith.addf %155, %156 : vector<2x256xf32>
    %158 = vector.extract_strided_slice %157 {offsets = [0, 0], sizes = [2, 192], strides = [1, 1]} : vector<2x256xf32> to vector<2x192xf32>
    %cst_63 = arith.constant 5.000000e-01 : f32
    %159 = vector.broadcast %cst_63 : f32 to vector<2x192xf32>
    %160 = arith.mulf %159, %158 : vector<2x192xf32>
    %161 = math.tanh %160 : vector<2x192xf32>
    %cst_64 = arith.constant 5.000000e-01 : f32
    %162 = vector.broadcast %cst_64 : f32 to vector<2x192xf32>
    %163 = arith.mulf %162, %161 : vector<2x192xf32>
    %cst_65 = arith.constant 5.000000e-01 : f32
    %164 = vector.broadcast %cst_65 : f32 to vector<2x192xf32>
    %165 = arith.addf %163, %164 : vector<2x192xf32>
    %166 = vector.extract_strided_slice %165 {offsets = [0, 0], sizes = [2, 64], strides = [1, 1]} : vector<2x192xf32> to vector<2x64xf32>
    %167 = vector.extract_strided_slice %165 {offsets = [0, 64], sizes = [2, 64], strides = [1, 1]} : vector<2x192xf32> to vector<2x64xf32>
    %168 = vector.extract_strided_slice %165 {offsets = [0, 128], sizes = [2, 64], strides = [1, 1]} : vector<2x192xf32> to vector<2x64xf32>
    %169 = vector.extract_strided_slice %157 {offsets = [0, 192], sizes = [2, 64], strides = [1, 1]} : vector<2x256xf32> to vector<2x64xf32>
    %170 = math.tanh %169 : vector<2x64xf32>
    %171 = arith.mulf %167, %127 : vector<2x64xf32>
    %172 = arith.mulf %166, %170 : vector<2x64xf32>
    %173 = arith.addf %171, %172 : vector<2x64xf32>
    %174 = math.tanh %173 : vector<2x64xf32>
    %175 = arith.mulf %168, %174 : vector<2x64xf32>
    %cst_66 = arith.constant dense<0.000000e+00> : vector<2x256xf32>
    %176 = tpu.matmul %175, %153, %cst_66 {dimension_numbers = #tpu.dot_dimension_numbers<[1], [0], [0], [1], [0, 0, 1, 1], [], []>} : vector<2x64xf32>, vector<64x256xf32>, vector<2x256xf32> -> vector<2x256xf32>
    %cst_67 = arith.constant dense<0.000000e+00> : vector<2x256xf32>
    %177 = tpu.matmul %151, %154, %cst_67 {dimension_numbers = #tpu.dot_dimension_numbers<[1], [0], [0], [1], [0, 0, 1, 1], [], []>} : vector<2x64xf32>, vector<64x256xf32>, vector<2x256xf32> -> vector<2x256xf32>
    %178 = arith.addf %176, %177 : vector<2x256xf32>
    %179 = arith.addf %178, %5 : vector<2x256xf32>
    %180 = vector.extract_strided_slice %179 {offsets = [0, 0], sizes = [2, 192], strides = [1, 1]} : vector<2x256xf32> to vector<2x192xf32>
    %cst_68 = arith.constant 5.000000e-01 : f32
    %181 = vector.broadcast %cst_68 : f32 to vector<2x192xf32>
    %182 = arith.mulf %181, %180 : vector<2x192xf32>
    %183 = math.tanh %182 : vector<2x192xf32>
    %cst_69 = arith.constant 5.000000e-01 : f32
    %184 = vector.broadcast %cst_69 : f32 to vector<2x192xf32>
    %185 = arith.mulf %184, %183 : vector<2x192xf32>
    %cst_70 = arith.constant 5.000000e-01 : f32
    %186 = vector.broadcast %cst_70 : f32 to vector<2x192xf32>
    %187 = arith.addf %185, %186 : vector<2x192xf32>
    %188 = vector.extract_strided_slice %187 {offsets = [0, 0], sizes = [2, 64], strides = [1, 1]} : vector<2x192xf32> to vector<2x64xf32>
    %189 = vector.extract_strided_slice %187 {offsets = [0, 64], sizes = [2, 64], strides = [1, 1]} : vector<2x192xf32> to vector<2x64xf32>
    %190 = vector.extract_strided_slice %187 {offsets = [0, 128], sizes = [2, 64], strides = [1, 1]} : vector<2x192xf32> to vector<2x64xf32>
    %191 = vector.extract_strided_slice %179 {offsets = [0, 192], sizes = [2, 64], strides = [1, 1]} : vector<2x256xf32> to vector<2x64xf32>
    %192 = math.tanh %191 : vector<2x64xf32>
    %193 = arith.mulf %189, %149 : vector<2x64xf32>
    %194 = arith.mulf %188, %192 : vector<2x64xf32>
    %195 = arith.addf %193, %194 : vector<2x64xf32>
    %196 = math.tanh %195 : vector<2x64xf32>
    %197 = arith.mulf %190, %196 : vector<2x64xf32>
    %c1_i32 = arith.constant 1 : i32
    %c8_i32_71 = arith.constant 8 : i32
    %198 = arith.muli %c1_i32, %c8_i32_71 : i32
    %199 = tpu.assume_multiple %198, 8 : i32
    %200 = arith.index_cast %199 : i32 to index
    %c0_72 = arith.constant 0 : index
    %201 = vector.load %arg1[%200, %c0_72] : memref<16x256xf32, #tpu.memory_space<vmem>>, vector<8x256xf32>
    %c0_73 = arith.constant 0 : index
    %c0_74 = arith.constant 0 : index
    %202 = vector.load %arg2[%c0_73, %c0_74] : memref<64x256xf32, #tpu.memory_space<vmem>>, vector<64x256xf32>
    %c0_75 = arith.constant 0 : index
    %c0_76 = arith.constant 0 : index
    %203 = vector.load %arg3[%c0_75, %c0_76] : memref<64x256xf32, #tpu.memory_space<vmem>>, vector<64x256xf32>
    %c0_77 = arith.constant 0 : index
    %c0_78 = arith.constant 0 : index
    %204 = vector.load %arg4[%c0_77, %c0_78] : memref<64x256xf32, #tpu.memory_space<vmem>>, vector<64x256xf32>
    %205 = vector.extract_strided_slice %201 {offsets = [0, 0], sizes = [2, 256], strides = [1, 1]} : vector<8x256xf32> to vector<2x256xf32>
    %cst_79 = arith.constant dense<0.000000e+00> : vector<2x256xf32>
    %206 = tpu.matmul %175, %202, %cst_79 {dimension_numbers = #tpu.dot_dimension_numbers<[1], [0], [0], [1], [0, 0, 1, 1], [], []>} : vector<2x64xf32>, vector<64x256xf32>, vector<2x256xf32> -> vector<2x256xf32>
    %207 = arith.addf %205, %206 : vector<2x256xf32>
    %208 = vector.extract_strided_slice %207 {offsets = [0, 0], sizes = [2, 192], strides = [1, 1]} : vector<2x256xf32> to vector<2x192xf32>
    %cst_80 = arith.constant 5.000000e-01 : f32
    %209 = vector.broadcast %cst_80 : f32 to vector<2x192xf32>
    %210 = arith.mulf %209, %208 : vector<2x192xf32>
    %211 = math.tanh %210 : vector<2x192xf32>
    %cst_81 = arith.constant 5.000000e-01 : f32
    %212 = vector.broadcast %cst_81 : f32 to vector<2x192xf32>
    %213 = arith.mulf %212, %211 : vector<2x192xf32>
    %cst_82 = arith.constant 5.000000e-01 : f32
    %214 = vector.broadcast %cst_82 : f32 to vector<2x192xf32>
    %215 = arith.addf %213, %214 : vector<2x192xf32>
    %216 = vector.extract_strided_slice %215 {offsets = [0, 0], sizes = [2, 64], strides = [1, 1]} : vector<2x192xf32> to vector<2x64xf32>
    %217 = vector.extract_strided_slice %215 {offsets = [0, 64], sizes = [2, 64], strides = [1, 1]} : vector<2x192xf32> to vector<2x64xf32>
    %218 = vector.extract_strided_slice %215 {offsets = [0, 128], sizes = [2, 64], strides = [1, 1]} : vector<2x192xf32> to vector<2x64xf32>
    %219 = vector.extract_strided_slice %207 {offsets = [0, 192], sizes = [2, 64], strides = [1, 1]} : vector<2x256xf32> to vector<2x64xf32>
    %220 = math.tanh %219 : vector<2x64xf32>
    %221 = arith.mulf %217, %173 : vector<2x64xf32>
    %222 = arith.mulf %216, %220 : vector<2x64xf32>
    %223 = arith.addf %221, %222 : vector<2x64xf32>
    %224 = math.tanh %223 : vector<2x64xf32>
    %225 = arith.mulf %218, %224 : vector<2x64xf32>
    %cst_83 = arith.constant dense<0.000000e+00> : vector<2x256xf32>
    %226 = tpu.matmul %225, %203, %cst_83 {dimension_numbers = #tpu.dot_dimension_numbers<[1], [0], [0], [1], [0, 0, 1, 1], [], []>} : vector<2x64xf32>, vector<64x256xf32>, vector<2x256xf32> -> vector<2x256xf32>
    %cst_84 = arith.constant dense<0.000000e+00> : vector<2x256xf32>
    %227 = tpu.matmul %197, %204, %cst_84 {dimension_numbers = #tpu.dot_dimension_numbers<[1], [0], [0], [1], [0, 0, 1, 1], [], []>} : vector<2x64xf32>, vector<64x256xf32>, vector<2x256xf32> -> vector<2x256xf32>
    %228 = arith.addf %226, %227 : vector<2x256xf32>
    %229 = arith.addf %228, %5 : vector<2x256xf32>
    %230 = vector.extract_strided_slice %229 {offsets = [0, 0], sizes = [2, 192], strides = [1, 1]} : vector<2x256xf32> to vector<2x192xf32>
    %cst_85 = arith.constant 5.000000e-01 : f32
    %231 = vector.broadcast %cst_85 : f32 to vector<2x192xf32>
    %232 = arith.mulf %231, %230 : vector<2x192xf32>
    %233 = math.tanh %232 : vector<2x192xf32>
    %cst_86 = arith.constant 5.000000e-01 : f32
    %234 = vector.broadcast %cst_86 : f32 to vector<2x192xf32>
    %235 = arith.mulf %234, %233 : vector<2x192xf32>
    %cst_87 = arith.constant 5.000000e-01 : f32
    %236 = vector.broadcast %cst_87 : f32 to vector<2x192xf32>
    %237 = arith.addf %235, %236 : vector<2x192xf32>
    %238 = vector.extract_strided_slice %237 {offsets = [0, 0], sizes = [2, 64], strides = [1, 1]} : vector<2x192xf32> to vector<2x64xf32>
    %239 = vector.extract_strided_slice %237 {offsets = [0, 64], sizes = [2, 64], strides = [1, 1]} : vector<2x192xf32> to vector<2x64xf32>
    %240 = vector.extract_strided_slice %237 {offsets = [0, 128], sizes = [2, 64], strides = [1, 1]} : vector<2x192xf32> to vector<2x64xf32>
    %241 = vector.extract_strided_slice %229 {offsets = [0, 192], sizes = [2, 64], strides = [1, 1]} : vector<2x256xf32> to vector<2x64xf32>
    %242 = math.tanh %241 : vector<2x64xf32>
    %243 = arith.mulf %239, %195 : vector<2x64xf32>
    %244 = arith.mulf %238, %242 : vector<2x64xf32>
    %245 = arith.addf %243, %244 : vector<2x64xf32>
    %246 = math.tanh %245 : vector<2x64xf32>
    %247 = arith.mulf %240, %246 : vector<2x64xf32>
    %c0_88 = arith.constant 0 : index
    %c0_89 = arith.constant 0 : index
    %248 = vector.load %arg2[%c0_88, %c0_89] : memref<64x256xf32, #tpu.memory_space<vmem>>, vector<64x256xf32>
    %c0_90 = arith.constant 0 : index
    %c0_91 = arith.constant 0 : index
    %249 = vector.load %arg3[%c0_90, %c0_91] : memref<64x256xf32, #tpu.memory_space<vmem>>, vector<64x256xf32>
    %c0_92 = arith.constant 0 : index
    %c0_93 = arith.constant 0 : index
    %250 = vector.load %arg4[%c0_92, %c0_93] : memref<64x256xf32, #tpu.memory_space<vmem>>, vector<64x256xf32>
    %251 = vector.extract_strided_slice %201 {offsets = [2, 0], sizes = [2, 256], strides = [1, 1]} : vector<8x256xf32> to vector<2x256xf32>
    %cst_94 = arith.constant dense<0.000000e+00> : vector<2x256xf32>
    %252 = tpu.matmul %225, %248, %cst_94 {dimension_numbers = #tpu.dot_dimension_numbers<[1], [0], [0], [1], [0, 0, 1, 1], [], []>} : vector<2x64xf32>, vector<64x256xf32>, vector<2x256xf32> -> vector<2x256xf32>
    %253 = arith.addf %251, %252 : vector<2x256xf32>
    %254 = vector.extract_strided_slice %253 {offsets = [0, 0], sizes = [2, 192], strides = [1, 1]} : vector<2x256xf32> to vector<2x192xf32>
    %cst_95 = arith.constant 5.000000e-01 : f32
    %255 = vector.broadcast %cst_95 : f32 to vector<2x192xf32>
    %256 = arith.mulf %255, %254 : vector<2x192xf32>
    %257 = math.tanh %256 : vector<2x192xf32>
    %cst_96 = arith.constant 5.000000e-01 : f32
    %258 = vector.broadcast %cst_96 : f32 to vector<2x192xf32>
    %259 = arith.mulf %258, %257 : vector<2x192xf32>
    %cst_97 = arith.constant 5.000000e-01 : f32
    %260 = vector.broadcast %cst_97 : f32 to vector<2x192xf32>
    %261 = arith.addf %259, %260 : vector<2x192xf32>
    %262 = vector.extract_strided_slice %261 {offsets = [0, 0], sizes = [2, 64], strides = [1, 1]} : vector<2x192xf32> to vector<2x64xf32>
    %263 = vector.extract_strided_slice %261 {offsets = [0, 64], sizes = [2, 64], strides = [1, 1]} : vector<2x192xf32> to vector<2x64xf32>
    %264 = vector.extract_strided_slice %261 {offsets = [0, 128], sizes = [2, 64], strides = [1, 1]} : vector<2x192xf32> to vector<2x64xf32>
    %265 = vector.extract_strided_slice %253 {offsets = [0, 192], sizes = [2, 64], strides = [1, 1]} : vector<2x256xf32> to vector<2x64xf32>
    %266 = math.tanh %265 : vector<2x64xf32>
    %267 = arith.mulf %263, %223 : vector<2x64xf32>
    %268 = arith.mulf %262, %266 : vector<2x64xf32>
    %269 = arith.addf %267, %268 : vector<2x64xf32>
    %270 = math.tanh %269 : vector<2x64xf32>
    %271 = arith.mulf %264, %270 : vector<2x64xf32>
    %cst_98 = arith.constant dense<0.000000e+00> : vector<2x256xf32>
    %272 = tpu.matmul %271, %249, %cst_98 {dimension_numbers = #tpu.dot_dimension_numbers<[1], [0], [0], [1], [0, 0, 1, 1], [], []>} : vector<2x64xf32>, vector<64x256xf32>, vector<2x256xf32> -> vector<2x256xf32>
    %cst_99 = arith.constant dense<0.000000e+00> : vector<2x256xf32>
    %273 = tpu.matmul %247, %250, %cst_99 {dimension_numbers = #tpu.dot_dimension_numbers<[1], [0], [0], [1], [0, 0, 1, 1], [], []>} : vector<2x64xf32>, vector<64x256xf32>, vector<2x256xf32> -> vector<2x256xf32>
    %274 = arith.addf %272, %273 : vector<2x256xf32>
    %275 = arith.addf %274, %5 : vector<2x256xf32>
    %276 = vector.extract_strided_slice %275 {offsets = [0, 0], sizes = [2, 192], strides = [1, 1]} : vector<2x256xf32> to vector<2x192xf32>
    %cst_100 = arith.constant 5.000000e-01 : f32
    %277 = vector.broadcast %cst_100 : f32 to vector<2x192xf32>
    %278 = arith.mulf %277, %276 : vector<2x192xf32>
    %279 = math.tanh %278 : vector<2x192xf32>
    %cst_101 = arith.constant 5.000000e-01 : f32
    %280 = vector.broadcast %cst_101 : f32 to vector<2x192xf32>
    %281 = arith.mulf %280, %279 : vector<2x192xf32>
    %cst_102 = arith.constant 5.000000e-01 : f32
    %282 = vector.broadcast %cst_102 : f32 to vector<2x192xf32>
    %283 = arith.addf %281, %282 : vector<2x192xf32>
    %284 = vector.extract_strided_slice %283 {offsets = [0, 0], sizes = [2, 64], strides = [1, 1]} : vector<2x192xf32> to vector<2x64xf32>
    %285 = vector.extract_strided_slice %283 {offsets = [0, 64], sizes = [2, 64], strides = [1, 1]} : vector<2x192xf32> to vector<2x64xf32>
    %286 = vector.extract_strided_slice %283 {offsets = [0, 128], sizes = [2, 64], strides = [1, 1]} : vector<2x192xf32> to vector<2x64xf32>
    %287 = vector.extract_strided_slice %275 {offsets = [0, 192], sizes = [2, 64], strides = [1, 1]} : vector<2x256xf32> to vector<2x64xf32>
    %288 = math.tanh %287 : vector<2x64xf32>
    %289 = arith.mulf %285, %245 : vector<2x64xf32>
    %290 = arith.mulf %284, %288 : vector<2x64xf32>
    %291 = arith.addf %289, %290 : vector<2x64xf32>
    %292 = math.tanh %291 : vector<2x64xf32>
    %293 = arith.mulf %286, %292 : vector<2x64xf32>
    %c0_103 = arith.constant 0 : index
    %c0_104 = arith.constant 0 : index
    %294 = vector.load %arg2[%c0_103, %c0_104] : memref<64x256xf32, #tpu.memory_space<vmem>>, vector<64x256xf32>
    %c0_105 = arith.constant 0 : index
    %c0_106 = arith.constant 0 : index
    %295 = vector.load %arg3[%c0_105, %c0_106] : memref<64x256xf32, #tpu.memory_space<vmem>>, vector<64x256xf32>
    %c0_107 = arith.constant 0 : index
    %c0_108 = arith.constant 0 : index
    %296 = vector.load %arg4[%c0_107, %c0_108] : memref<64x256xf32, #tpu.memory_space<vmem>>, vector<64x256xf32>
    %297 = vector.extract_strided_slice %201 {offsets = [4, 0], sizes = [2, 256], strides = [1, 1]} : vector<8x256xf32> to vector<2x256xf32>
    %cst_109 = arith.constant dense<0.000000e+00> : vector<2x256xf32>
    %298 = tpu.matmul %271, %294, %cst_109 {dimension_numbers = #tpu.dot_dimension_numbers<[1], [0], [0], [1], [0, 0, 1, 1], [], []>} : vector<2x64xf32>, vector<64x256xf32>, vector<2x256xf32> -> vector<2x256xf32>
    %299 = arith.addf %297, %298 : vector<2x256xf32>
    %300 = vector.extract_strided_slice %299 {offsets = [0, 0], sizes = [2, 192], strides = [1, 1]} : vector<2x256xf32> to vector<2x192xf32>
    %cst_110 = arith.constant 5.000000e-01 : f32
    %301 = vector.broadcast %cst_110 : f32 to vector<2x192xf32>
    %302 = arith.mulf %301, %300 : vector<2x192xf32>
    %303 = math.tanh %302 : vector<2x192xf32>
    %cst_111 = arith.constant 5.000000e-01 : f32
    %304 = vector.broadcast %cst_111 : f32 to vector<2x192xf32>
    %305 = arith.mulf %304, %303 : vector<2x192xf32>
    %cst_112 = arith.constant 5.000000e-01 : f32
    %306 = vector.broadcast %cst_112 : f32 to vector<2x192xf32>
    %307 = arith.addf %305, %306 : vector<2x192xf32>
    %308 = vector.extract_strided_slice %307 {offsets = [0, 0], sizes = [2, 64], strides = [1, 1]} : vector<2x192xf32> to vector<2x64xf32>
    %309 = vector.extract_strided_slice %307 {offsets = [0, 64], sizes = [2, 64], strides = [1, 1]} : vector<2x192xf32> to vector<2x64xf32>
    %310 = vector.extract_strided_slice %307 {offsets = [0, 128], sizes = [2, 64], strides = [1, 1]} : vector<2x192xf32> to vector<2x64xf32>
    %311 = vector.extract_strided_slice %299 {offsets = [0, 192], sizes = [2, 64], strides = [1, 1]} : vector<2x256xf32> to vector<2x64xf32>
    %312 = math.tanh %311 : vector<2x64xf32>
    %313 = arith.mulf %309, %269 : vector<2x64xf32>
    %314 = arith.mulf %308, %312 : vector<2x64xf32>
    %315 = arith.addf %313, %314 : vector<2x64xf32>
    %316 = math.tanh %315 : vector<2x64xf32>
    %317 = arith.mulf %310, %316 : vector<2x64xf32>
    %cst_113 = arith.constant dense<0.000000e+00> : vector<2x256xf32>
    %318 = tpu.matmul %317, %295, %cst_113 {dimension_numbers = #tpu.dot_dimension_numbers<[1], [0], [0], [1], [0, 0, 1, 1], [], []>} : vector<2x64xf32>, vector<64x256xf32>, vector<2x256xf32> -> vector<2x256xf32>
    %cst_114 = arith.constant dense<0.000000e+00> : vector<2x256xf32>
    %319 = tpu.matmul %293, %296, %cst_114 {dimension_numbers = #tpu.dot_dimension_numbers<[1], [0], [0], [1], [0, 0, 1, 1], [], []>} : vector<2x64xf32>, vector<64x256xf32>, vector<2x256xf32> -> vector<2x256xf32>
    %320 = arith.addf %318, %319 : vector<2x256xf32>
    %321 = arith.addf %320, %5 : vector<2x256xf32>
    %322 = vector.extract_strided_slice %321 {offsets = [0, 0], sizes = [2, 192], strides = [1, 1]} : vector<2x256xf32> to vector<2x192xf32>
    %cst_115 = arith.constant 5.000000e-01 : f32
    %323 = vector.broadcast %cst_115 : f32 to vector<2x192xf32>
    %324 = arith.mulf %323, %322 : vector<2x192xf32>
    %325 = math.tanh %324 : vector<2x192xf32>
    %cst_116 = arith.constant 5.000000e-01 : f32
    %326 = vector.broadcast %cst_116 : f32 to vector<2x192xf32>
    %327 = arith.mulf %326, %325 : vector<2x192xf32>
    %cst_117 = arith.constant 5.000000e-01 : f32
    %328 = vector.broadcast %cst_117 : f32 to vector<2x192xf32>
    %329 = arith.addf %327, %328 : vector<2x192xf32>
    %330 = vector.extract_strided_slice %329 {offsets = [0, 0], sizes = [2, 64], strides = [1, 1]} : vector<2x192xf32> to vector<2x64xf32>
    %331 = vector.extract_strided_slice %329 {offsets = [0, 64], sizes = [2, 64], strides = [1, 1]} : vector<2x192xf32> to vector<2x64xf32>
    %332 = vector.extract_strided_slice %329 {offsets = [0, 128], sizes = [2, 64], strides = [1, 1]} : vector<2x192xf32> to vector<2x64xf32>
    %333 = vector.extract_strided_slice %321 {offsets = [0, 192], sizes = [2, 64], strides = [1, 1]} : vector<2x256xf32> to vector<2x64xf32>
    %334 = math.tanh %333 : vector<2x64xf32>
    %335 = arith.mulf %331, %291 : vector<2x64xf32>
    %336 = arith.mulf %330, %334 : vector<2x64xf32>
    %337 = arith.addf %335, %336 : vector<2x64xf32>
    %338 = math.tanh %337 : vector<2x64xf32>
    %339 = arith.mulf %332, %338 : vector<2x64xf32>
    %c0_118 = arith.constant 0 : index
    %c0_119 = arith.constant 0 : index
    %340 = vector.load %arg2[%c0_118, %c0_119] : memref<64x256xf32, #tpu.memory_space<vmem>>, vector<64x256xf32>
    %c0_120 = arith.constant 0 : index
    %c0_121 = arith.constant 0 : index
    %341 = vector.load %arg3[%c0_120, %c0_121] : memref<64x256xf32, #tpu.memory_space<vmem>>, vector<64x256xf32>
    %c0_122 = arith.constant 0 : index
    %c0_123 = arith.constant 0 : index
    %342 = vector.load %arg4[%c0_122, %c0_123] : memref<64x256xf32, #tpu.memory_space<vmem>>, vector<64x256xf32>
    %343 = vector.extract_strided_slice %201 {offsets = [6, 0], sizes = [2, 256], strides = [1, 1]} : vector<8x256xf32> to vector<2x256xf32>
    %cst_124 = arith.constant dense<0.000000e+00> : vector<2x256xf32>
    %344 = tpu.matmul %317, %340, %cst_124 {dimension_numbers = #tpu.dot_dimension_numbers<[1], [0], [0], [1], [0, 0, 1, 1], [], []>} : vector<2x64xf32>, vector<64x256xf32>, vector<2x256xf32> -> vector<2x256xf32>
    %345 = arith.addf %343, %344 : vector<2x256xf32>
    %346 = vector.extract_strided_slice %345 {offsets = [0, 0], sizes = [2, 192], strides = [1, 1]} : vector<2x256xf32> to vector<2x192xf32>
    %cst_125 = arith.constant 5.000000e-01 : f32
    %347 = vector.broadcast %cst_125 : f32 to vector<2x192xf32>
    %348 = arith.mulf %347, %346 : vector<2x192xf32>
    %349 = math.tanh %348 : vector<2x192xf32>
    %cst_126 = arith.constant 5.000000e-01 : f32
    %350 = vector.broadcast %cst_126 : f32 to vector<2x192xf32>
    %351 = arith.mulf %350, %349 : vector<2x192xf32>
    %cst_127 = arith.constant 5.000000e-01 : f32
    %352 = vector.broadcast %cst_127 : f32 to vector<2x192xf32>
    %353 = arith.addf %351, %352 : vector<2x192xf32>
    %354 = vector.extract_strided_slice %353 {offsets = [0, 0], sizes = [2, 64], strides = [1, 1]} : vector<2x192xf32> to vector<2x64xf32>
    %355 = vector.extract_strided_slice %353 {offsets = [0, 64], sizes = [2, 64], strides = [1, 1]} : vector<2x192xf32> to vector<2x64xf32>
    %356 = vector.extract_strided_slice %353 {offsets = [0, 128], sizes = [2, 64], strides = [1, 1]} : vector<2x192xf32> to vector<2x64xf32>
    %357 = vector.extract_strided_slice %345 {offsets = [0, 192], sizes = [2, 64], strides = [1, 1]} : vector<2x256xf32> to vector<2x64xf32>
    %358 = math.tanh %357 : vector<2x64xf32>
    %359 = arith.mulf %355, %315 : vector<2x64xf32>
    %360 = arith.mulf %354, %358 : vector<2x64xf32>
    %361 = arith.addf %359, %360 : vector<2x64xf32>
    %362 = math.tanh %361 : vector<2x64xf32>
    %363 = arith.mulf %356, %362 : vector<2x64xf32>
    %cst_128 = arith.constant dense<0.000000e+00> : vector<2x256xf32>
    %364 = tpu.matmul %363, %341, %cst_128 {dimension_numbers = #tpu.dot_dimension_numbers<[1], [0], [0], [1], [0, 0, 1, 1], [], []>} : vector<2x64xf32>, vector<64x256xf32>, vector<2x256xf32> -> vector<2x256xf32>
    %cst_129 = arith.constant dense<0.000000e+00> : vector<2x256xf32>
    %365 = tpu.matmul %339, %342, %cst_129 {dimension_numbers = #tpu.dot_dimension_numbers<[1], [0], [0], [1], [0, 0, 1, 1], [], []>} : vector<2x64xf32>, vector<64x256xf32>, vector<2x256xf32> -> vector<2x256xf32>
    %366 = arith.addf %364, %365 : vector<2x256xf32>
    %367 = arith.addf %366, %5 : vector<2x256xf32>
    %368 = vector.extract_strided_slice %367 {offsets = [0, 0], sizes = [2, 192], strides = [1, 1]} : vector<2x256xf32> to vector<2x192xf32>
    %cst_130 = arith.constant 5.000000e-01 : f32
    %369 = vector.broadcast %cst_130 : f32 to vector<2x192xf32>
    %370 = arith.mulf %369, %368 : vector<2x192xf32>
    %371 = math.tanh %370 : vector<2x192xf32>
    %cst_131 = arith.constant 5.000000e-01 : f32
    %372 = vector.broadcast %cst_131 : f32 to vector<2x192xf32>
    %373 = arith.mulf %372, %371 : vector<2x192xf32>
    %cst_132 = arith.constant 5.000000e-01 : f32
    %374 = vector.broadcast %cst_132 : f32 to vector<2x192xf32>
    %375 = arith.addf %373, %374 : vector<2x192xf32>
    %376 = vector.extract_strided_slice %375 {offsets = [0, 0], sizes = [2, 64], strides = [1, 1]} : vector<2x192xf32> to vector<2x64xf32>
    %377 = vector.extract_strided_slice %375 {offsets = [0, 64], sizes = [2, 64], strides = [1, 1]} : vector<2x192xf32> to vector<2x64xf32>
    %378 = vector.extract_strided_slice %375 {offsets = [0, 128], sizes = [2, 64], strides = [1, 1]} : vector<2x192xf32> to vector<2x64xf32>
    %379 = vector.extract_strided_slice %367 {offsets = [0, 192], sizes = [2, 64], strides = [1, 1]} : vector<2x256xf32> to vector<2x64xf32>
    %380 = math.tanh %379 : vector<2x64xf32>
    %381 = arith.mulf %377, %337 : vector<2x64xf32>
    %382 = arith.mulf %376, %380 : vector<2x64xf32>
    %383 = arith.addf %381, %382 : vector<2x64xf32>
    %384 = math.tanh %383 : vector<2x64xf32>
    %385 = arith.mulf %378, %384 : vector<2x64xf32>
    %c2_i32 = arith.constant 2 : i32
    %c0_133 = arith.constant 0 : index
    %c0_134 = arith.constant 0 : index
    %386 = vector.load %arg9[%c0_133, %c0_134] : memref<2x64xf32, #tpu.memory_space<vmem>>, vector<2x64xf32>
    tpu.vector_store %arg9[%c0_133, %c0_134], %363 {strides = array<i32>} : memref<2x64xf32, #tpu.memory_space<vmem>>, vector<2x64xf32>,
    %c0_135 = arith.constant 0 : index
    %c0_136 = arith.constant 0 : index
    %387 = vector.load %arg10[%c0_135, %c0_136] : memref<2x64xf32, #tpu.memory_space<vmem>>, vector<2x64xf32>
    tpu.vector_store %arg10[%c0_135, %c0_136], %361 {strides = array<i32>} : memref<2x64xf32, #tpu.memory_space<vmem>>, vector<2x64xf32>,
    %c0_137 = arith.constant 0 : index
    %c0_138 = arith.constant 0 : index
    %388 = vector.load %arg11[%c0_137, %c0_138] : memref<2x64xf32, #tpu.memory_space<vmem>>, vector<2x64xf32>
    tpu.vector_store %arg11[%c0_137, %c0_138], %385 {strides = array<i32>} : memref<2x64xf32, #tpu.memory_space<vmem>>, vector<2x64xf32>,
    %c0_139 = arith.constant 0 : index
    %c0_140 = arith.constant 0 : index
    %389 = vector.load %arg12[%c0_139, %c0_140] : memref<2x64xf32, #tpu.memory_space<vmem>>, vector<2x64xf32>
    tpu.vector_store %arg12[%c0_139, %c0_140], %383 {strides = array<i32>} : memref<2x64xf32, #tpu.memory_space<vmem>>, vector<2x64xf32>,
    %c0_i32_141 = arith.constant 0 : i32
    %390 = arith.cmpi eq, %arg0, %c0_i32_141 : i32
    %391 = arith.extui %390 : i1 to i32
    %c0_i32_142 = arith.constant 0 : i32
    %392 = arith.cmpi ne, %391, %c0_i32_142 : i32
    scf.if %392 {
      %c0_143 = arith.constant 0 : index
      %c0_144 = arith.constant 0 : index
      %393 = vector.load %arg6[%c0_143, %c0_144] : memref<1x64xf32, #tpu.memory_space<vmem>>, vector<1x64xf32>
      %394 = vector.broadcast %393 : vector<1x64xf32> to vector<2x64xf32>
      %395 = arith.mulf %385, %394 : vector<2x64xf32>
      %cst_145 = arith.constant dense<0.000000e+00> : vector<2xf32>
      %396 = vector.multi_reduction <add>, %395, %cst_145 [1] : vector<2x64xf32> to vector<2xf32>
      %397 = vector.shape_cast %396 : vector<2xf32> to vector<2x1xf32>
      %c0_146 = arith.constant 0 : index
      %c0_147 = arith.constant 0 : index
      %398 = vector.load %arg7[%c0_146, %c0_147] : memref<1x1xf32, #tpu.memory_space<vmem>>, vector<1x1xf32>
      %399 = vector.broadcast %398 : vector<1x1xf32> to vector<2x1xf32>
      %400 = arith.addf %397, %399 : vector<2x1xf32>
      %c0_148 = arith.constant 0 : index
      %c0_149 = arith.constant 0 : index
      %401 = vector.load %arg8[%c0_148, %c0_149] : memref<2x1xf32, #tpu.memory_space<vmem>>, vector<2x1xf32>
      tpu.vector_store %arg8[%c0_148, %c0_149], %400 {strides = array<i32>} : memref<2x1xf32, #tpu.memory_space<vmem>>, vector<2x1xf32>,
    } else {
    }
    return
  }
  func.func @transform_0(%arg0: i32) -> (i32, i32) {
    %c0_i32 = arith.constant 0 : i32
    %c0_i32_0 = arith.constant 0 : i32
    return %arg0, %c0_i32 : i32, i32
  }
  func.func @transform_1(%arg0: i32) -> (i32, i32) {
    %c0_i32 = arith.constant 0 : i32
    %c0_i32_0 = arith.constant 0 : i32
    %c0_i32_1 = arith.constant 0 : i32
    return %c0_i32, %c0_i32_0 : i32, i32
  }
  func.func @transform_2(%arg0: i32) -> (i32, i32) {
    %c0_i32 = arith.constant 0 : i32
    %c0_i32_0 = arith.constant 0 : i32
    %c0_i32_1 = arith.constant 0 : i32
    return %c0_i32, %c0_i32_0 : i32, i32
  }
  func.func @transform_3(%arg0: i32) -> (i32, i32) {
    %c0_i32 = arith.constant 0 : i32
    %c0_i32_0 = arith.constant 0 : i32
    %c0_i32_1 = arith.constant 0 : i32
    return %c0_i32, %c0_i32_0 : i32, i32
  }
  func.func @transform_4(%arg0: i32) -> (i32, i32) {
    %c0_i32 = arith.constant 0 : i32
    %c0_i32_0 = arith.constant 0 : i32
    %c0_i32_1 = arith.constant 0 : i32
    return %c0_i32, %c0_i32_0 : i32, i32
  }
  func.func @transform_5(%arg0: i32) -> (i32, i32) {
    %c0_i32 = arith.constant 0 : i32
    %c0_i32_0 = arith.constant 0 : i32
    %c0_i32_1 = arith.constant 0 : i32
    return %c0_i32, %c0_i32_0 : i32, i32
  }
  func.func @transform_6(%arg0: i32) -> (i32, i32) {
    %c0_i32 = arith.constant 0 : i32
    %c0_i32_0 = arith.constant 0 : i32
    %c0_i32_1 = arith.constant 0 : i32
    return %c0_i32, %c0_i32_0 : i32, i32
  }
  func.func @transform_7(%arg0: i32) -> (i32, i32) {
    %c0_i32 = arith.constant 0 : i32
    %c0_i32_0 = arith.constant 0 : i32
    %c0_i32_1 = arith.constant 0 : i32
    return %c0_i32, %c0_i32_0 : i32, i32
  }
}

</mosaic_0001>

<bundles_post_ra>
// kernel: energy_price_lstm_forward.1
= control target key start
LH: loop header
LB: loop body
LE: loop exit
PB: predicated region body
PF: predicated region fallthrough
CT: control target
= control target key end

     0   :  { %vm32_vm0 = vcmask 517120   ;;  %v2987_v3 = vmov 0.0   ;;  %vm106_vm1 = vcmask 523264   ;;  %s2988_s11 = smov 64   ;;  %vm2386_vm2 = vcmask 523270   ;;  %s3654_s1 = inlined_call_operand.vmem [shape: f32[64,256], index: 1, kind: input, shape index: {}]   ;;  %s3655_s0 = inlined_call_operand.vmem [shape: f32[16,256], index: 0, kind: input, shape index: {}]   ;;  %s3656_s3 = inlined_call_operand.vmem [shape: f32[64,256], index: 3, kind: input, shape index: {}]   ;;  %s3657_s2 = inlined_call_operand.vmem [shape: f32[64,256], index: 2, kind: input, shape index: {}]   ;;  %s3658_s4 = inlined_call_operand.vmem [shape: f32[1,256], index: 4, kind: input, shape index: {}]   ;;  %s3659_s6 = inlined_call_operand.<no memory space> [shape: f32[1,1], index: 6, kind: input, shape index: {}]   ;;  %s3660_s5 = inlined_call_operand.vmem [shape: f32[1,64], index: 5, kind: input, shape index: {}]   ;;  %s3661_s7 = inlined_call_operand.vmem [shape: f32[2,1], index: 7, kind: output, shape index: {}]  }
   0x1   :  { %v59_v0 = vld [vmem:[%s3654_s1 + $0x8] sm:$0xff]  ;;  %v61_v1 = vld [vmem:[%s3654_s1 + $0x18] sm:$0xff]  ;;  %v58_v2 = vld [vmem:[%s3654_s1] sm:$0xff]  ;;  %174 = vmatprep.mubr.f32.mxu1 %v2987_v3  ;;  %33 = vst.msk [vmem:[#allocation2] sm:$0x3] %vm32_vm0, %v2987_v3  ;;  %457 = vmatprep.mubr.f32.mxu0 %v2987_v3  ;;  %vm2422_vm3 = vcmask 1024  }
   0x2   :  { %34 = vst.msk [vmem:[#allocation3] sm:$0x3] %vm32_vm0, %v2987_v3  ;;  %35 = vst.msk [vmem:[#allocation4] sm:$0x3] %vm32_vm0, %v2987_v3  ;;  %v3048_v4 = vpack.c.bf16 %v61_v1, %v59_v0  ;;  %v60_v5 = vld [vmem:[%s3654_s1 + $0x10] sm:$0xff]  ;;  %v63_v6 = vld [vmem:[%s3654_s1 + $0x28] sm:$0xff] }
   0x3   :  { %36 = vst.msk [vmem:[#allocation5] sm:$0x3] %vm32_vm0, %v2987_v3  ;;  %v65_v7 = vld [vmem:[%s3654_s1 + $0x38] sm:$0xff]  ;;  %v3059_v8 = vpack.c.bf16 %v60_v5, %v58_v2  ;;  %v62_v10 = vld [vmem:[%s3654_s1 + $0x20] sm:$0xff]  ;;  %v64_v11 = vld [vmem:[%s3654_s1 + $0x30] sm:$0xff] }
   0x4   :  { %v3061_v9 = vpack.c.bf16 %v65_v7, %v63_v6  ;;  %v67_v12 = vld [vmem:[%s3654_s1 + $0x48] sm:$0xff]  ;;  %2458 = vmatprep.subr.bf16.mxu1 %v3048_v4  ;;  %v69_v13 = vld [vmem:[%s3654_s1 + $0x58] sm:$0xff]  ;;  %2506 = vmatprep.subr.bf16.mxu0 %v3048_v4  ;;  %v3078_v14 = vpack.c.bf16 %v64_v11, %v62_v10  ;;  %v66_v16 = vld [vmem:[%s3654_s1 + $0x40] sm:$0xff] }
   0x5   :  { %2460 = vmatpush1.bf16.msra.mxu1 %v3059_v8  ;;  %2508 = vmatpush1.bf16.msra.mxu0 %v3059_v8  ;;  %v3082_v15 = vpack.c.bf16 %v69_v13, %v67_v12  ;;  %v68_v17 = vld [vmem:[%s3654_s1 + $0x50] sm:$0xff]  ;;  %v71_v18 = vld [vmem:[%s3654_s1 + $0x68] sm:$0xff]  ;;  %v73_v19 = vld [vmem:[%s3654_s1 + $0x78] sm:$0xff] }
   0x6   :  { %2462 = vmatprep.subr.bf16.mxu1 %v3061_v9  ;;  %2510 = vmatprep.subr.bf16.mxu0 %v3061_v9  ;;  %v3098_v20 = vpack.c.bf16 %v68_v17, %v66_v16  ;;  %v3102_v21 = vpack.c.bf16 %v73_v19, %v71_v18  ;;  %v70_v22 = vld [vmem:[%s3654_s1 + $0x60] sm:$0xff]  ;;  %v72_v23 = vld [vmem:[%s3654_s1 + $0x70] sm:$0xff]  ;;  %v3124_v26 = vld [vmem:[%s3655_s0 + $0x8] sm:$0xff] }
   0x7   :  { %v3112_v24 = vpack.c.bf16 %v72_v23, %v70_v22  ;;  %v3135_v32 = vld [vmem:[%s3655_s0] sm:$0xff]  ;;  %v91_v40 = vld [vmem:[%s3656_s3 + $0x8] sm:$0xff]  ;;  %v93_v41 = vld [vmem:[%s3656_s3 + $0x18] sm:$0xff] }
   0x8   :  { %v49_v25 = vld [vmem:[#allocation2] sm:$0x3]  ;;  %v3151_v43 = vpack.c.bf16 %v93_v41, %v91_v40  ;;  %v92_v44 = vld [vmem:[%s3656_s3 + $0x10] sm:$0xff]  ;;  %v95_v45 = vld [vmem:[%s3656_s3 + $0x28] sm:$0xff] }
   0x9   :  { %2464 = vmatpush1.bf16.msra.mxu1 %v3078_v14  ;;  %2512 = vmatpush1.bf16.msra.mxu0 %v3078_v14  ;;  %v50_v31 = vld [vmem:[#allocation3] sm:$0x3]  ;;  %v97_v46 = vld [vmem:[%s3656_s3 + $0x38] sm:$0xff]  ;;  %v96_v50 = vld [vmem:[%s3656_s3 + $0x30] sm:$0xff] }
   0xa   :  { %2466 = vmatprep.subr.bf16.mxu1 %v3082_v15  ;;  %2514 = vmatprep.subr.bf16.mxu0 %v3082_v15  ;;  %v90_v42 = vld [vmem:[%s3656_s3] sm:$0xff]  ;;  %v3164_v48 = vpack.c.bf16 %v97_v46, %v95_v45  ;;  %v99_v51 = vld [vmem:[%s3656_s3 + $0x48] sm:$0xff]  ;;  %v101_v52 = vld [vmem:[%s3656_s3 + $0x58] sm:$0xff] }
   0xb   :  { %v3162_v47 = vpack.c.bf16 %v92_v44, %v90_v42  ;;  %v94_v49 = vld [vmem:[%s3656_s3 + $0x20] sm:$0xff]  ;;  %v3184_v54 = vpack.c.bf16 %v101_v52, %v99_v51  ;;  %v100_v56 = vld [vmem:[%s3656_s3 + $0x50] sm:$0xff]  ;;  %v103_v57 = vld [vmem:[%s3656_s3 + $0x68] sm:$0xff] }
   0xc   :  { %v3181_v53 = vpack.c.bf16 %v96_v50, %v94_v49  ;;  %v98_v55 = vld [vmem:[%s3656_s3 + $0x40] sm:$0xff]  ;;  %v105_v58 = vld [vmem:[%s3656_s3 + $0x78] sm:$0xff]  ;;  %v104_v62 = vld [vmem:[%s3656_s3 + $0x70] sm:$0xff] }
   0xd   :  { %2468 = vmatpush1.bf16.msra.mxu1 %v3098_v20  ;;  %2516 = vmatpush1.bf16.msra.mxu0 %v3098_v20  ;;  %v3199_v59 = vpack.c.bf16 %v100_v56, %v98_v55  ;;  %v3202_v60 = vpack.c.bf16 %v105_v58, %v103_v57  ;;  %v102_v61 = vld [vmem:[%s3656_s3 + $0x60] sm:$0xff]  ;;  %v75_v63 = vld [vmem:[%s3657_s2 + $0x8] sm:$0xff]  ;;  %v77_v0 = vld [vmem:[%s3657_s2 + $0x18] sm:$0xff] }
   0xe   :  { %2470 = vmatprep.subr.bf16.mxu1 %v3102_v21  ;;  %2518 = vmatprep.subr.bf16.mxu0 %v3102_v21  ;;  %v3217_v1 = vpack.c.bf16 %v104_v62, %v102_v61  ;;  %v3220_v2 = vpack.c.bf16 %v77_v0, %v75_v63  ;;  %v74_v5 = vld [vmem:[%s3657_s2] sm:$0xff]  ;;  %v76_v6 = vld [vmem:[%s3657_s2 + $0x10] sm:$0xff]  ;;  %v79_v7 = vld [vmem:[%s3657_s2 + $0x28] sm:$0xff] }
   0xf   :  { %v81_v10 = vld [vmem:[%s3657_s2 + $0x38] sm:$0xff]  ;;  %v51_v11 = vld [vmem:[#allocation4] sm:$0x3]  ;;  %v3235_v12 = vpack.c.bf16 %v76_v6, %v74_v5  ;;  %v80_v17 = vld [vmem:[%s3657_s2 + $0x30] sm:$0xff] }
  0x10   :  { %v3238_v13 = vpack.c.bf16 %v81_v10, %v79_v7  ;;  %v78_v16 = vld [vmem:[%s3657_s2 + $0x20] sm:$0xff]  ;;  %v83_v18 = vld [vmem:[%s3657_s2 + $0x48] sm:$0xff]  ;;  %v85_v19 = vld [vmem:[%s3657_s2 + $0x58] sm:$0xff] }
  0x11   :  { %2472 = vmatpush1.bf16.msra.mxu1 %v3112_v24  ;;  %2520 = vmatpush1.bf16.msra.mxu0 %v3112_v24  ;;  %v3254_v22 = vpack.c.bf16 %v80_v17, %v78_v16  ;;  %v3258_v23 = vpack.c.bf16 %v85_v19, %v83_v18  ;;  %v37_v55 = vld [vmem:[%s3658_s4] sm:$0x3]  ;;  %v52_v7 = vld [vmem:[#allocation5] sm:$0x3] }
  0x12   :  { %2474 = vmatprep.subr.bf16.mxu1 %v3151_v43  ;;  %2522 = vmatprep.subr.bf16.mxu0 %v3151_v43 }
  0x14   :  { %2429 = vmatmul.mubr.msk.f32.vlgmr.msra.gmra.mrb[0].mxu1 %vm106_vm1, %v49_v25  ;;  %v82_v25 = vld [vmem:[%s3657_s2 + $0x40] sm:$0xff] }
  0x15   :  { %280 = vmatprep.mubr.f32.mxu1 %v2987_v3  ;;  %2476 = vmatpush1.bf16.msra.mxu1 %v3162_v47 }
  0x16   :  { %2478 = vmatprep.subr.bf16.mxu1 %v3164_v48 }
  0x19   :  { %2480 = vmatpush1.bf16.msra.mxu1 %v3181_v53 }
  0x1a   :  { %2482 = vmatprep.subr.bf16.mxu1 %v3184_v54 }
  0x1d   :  { %2484 = vmatpush1.bf16.msra.mxu1 %v3199_v59 }
  0x1e   :  { %2486 = vmatprep.subr.bf16.mxu1 %v3202_v60 }
  0x21   :  { %2488 = vmatpush1.bf16.msra.mxu1 %v3217_v1 }
  0x22   :  { %2490 = vmatprep.subr.bf16.mxu1 %v3220_v2 }
  0x24   :  { %2430 = vmatmul.mubr.msk.f32.vlgmr.msra.gmra.mrb[2].mxu1 %vm106_vm1, %v51_v11 }
  0x25   :  { %2492 = vmatpush1.bf16.msra.mxu1 %v3235_v12  ;;  %354 = vmatprep.mubr.f32.mxu1 %v2987_v3 }
  0x26   :  { %2494 = vmatprep.subr.bf16.mxu1 %v3238_v13 }
  0x29   :  { %2496 = vmatpush1.bf16.msra.mxu1 %v3254_v22 }
  0x2a   :  { %2498 = vmatprep.subr.bf16.mxu1 %v3258_v23 }
  0xe7   :  { %v176_v27 = vpop.f32.mrb[0].mxu1 }
  0xe8   :  { %v178_v28 = vpop.f32.mrb[1].mxu1  ;;  %v181_v33 = vadd.f32 %v176_v27, %v3135_v32  ;;  %v84_v27 = vld [vmem:[%s3657_s2 + $0x50] sm:$0xff] }
  0xe9   :  { %v3127_v29 = vadd.f32 %v178_v28, %v3124_v26  ;;  %v87_v28 = vld [vmem:[%s3657_s2 + $0x68] sm:$0xff] }
  0xea   :  { %v183_v34 = vmul.f32 0.5, %v181_v33 }
  0xeb   :  { %2859 = vtanh.f32 %v3127_v29  ;;  %v184_v44 = vmul.f32 0.5, %v3127_v29  ;;  %v39_v29 = vlaneseq }
  0xec   :  { %2861 = vtanh.f32 %v183_v34  ;;  %v86_v34 = vld [vmem:[%s3657_s2 + $0x60] sm:$0xff] }
  0xf5   :  { %v2860_v30 = vpop.eup %2859 }
  0xf6   :  { %198 = vrot.lane.b32.xlu0 %v2860_v30, %s2988_s11  ;;  %v2862_v35 = vpop.eup %2861  ;;  %v89_v30 = vld [vmem:[%s3657_s2 + $0x78] sm:$0xff] }
  0xf7   :  { %v187_v36 = vmul.f32 0.5, %v2862_v35  ;;  %v3276_v33 = vpack.c.bf16 %v89_v30, %v87_v28  ;;  %v88_v35 = vld [vmem:[%s3657_s2 + $0x70] sm:$0xff] }
  0xf9   :  { %v3138_v37 = vadd.f32 0.5, %v187_v36  ;;  %v3285_v36 = vpack.c.bf16 %v88_v35, %v86_v34 }
  0xfa   :  { %193 = vrot.lane.b32.xlu0 %v50_v31, %s2988_s11  ;;  %v3273_v31 = vpack.c.bf16 %v84_v27, %v82_v25 }
  0xfc   :  { %2500 = vmatpush1.bf16.msra.mxu1 %v3273_v31 }
  0xfd   :  { %2502 = vmatprep.subr.bf16.mxu1 %v3276_v33 }
 0x100   :  { %2504 = vmatpush1.bf16.msra.mxu1 %v3285_v36 }
 0x101   :  { %2554 = vmatprep.subr.bf16.mxu1 %v3048_v4 }
 0x168   :  { %v199_v38 = vpop.permute.xlu0 %198 }
 0x169   :  { %v201_v39 = vmul.f32 %v199_v38, %v3138_v37 }
 0x16b   :  { %203 = vrot.lane.b32.xlu1 %v201_v39, %s2988_s11 }
 0x16c   :  { %v194_v38 = vpop.permute.xlu0 %193 }
 0x16d   :  { %v196_v39 = vmul.f32 %v194_v38, %v3138_v37  ;;  %v40_v37 = vshrl.u32 %v39_v29, 7 }
 0x16f   :  { %v45_v52 = vsub.s32 1, %v40_v37  ;;  %v41_v11 = vsub.s32 0, %v40_v37 }
 0x171   :  { %v3319_v56 = vrot.slane %v37_v55, %v45_v52  ;;  %v3326_v16 = vrot.slane %v37_v55, %v41_v11 }
 0x1dd   :  { %v204_v40 = vpop.permute.xlu1 %203 }
 0x1de   :  { %v3291_v41 = vadd.f32 %v204_v40, %v196_v39 }
 0x1e0   :  { %2863 = vtanh.f32 %v3291_v41  ;;  %v482_v29 = vrot.slane %v3291_v41, 6 }
 0x1e1   :  { %2865 = vtanh.f32 %v184_v44 }
 0x1ea   :  { %v2864_v42 = vpop.eup %2863 }
 0x1eb   :  { %209 = vrot.lane.b32.xlu1 %v2864_v42, %s2988_s11  ;;  %v2866_v45 = vpop.eup %2865 }
 0x1ec   :  { %v188_v46 = vmul.f32 0.5, %v2866_v45 }
 0x1ee   :  { %v190_v49 = vadd.f32 0.5, %v188_v46 }
 0x25d   :  { %v210_v50 = vpop.permute.xlu1 %209 }
 0x25e   :  { %v212_v51 = vmul.f32 %v210_v50, %v190_v49 }
 0x260   :  { %2431 = vmatmul.mubr.msk.f32.vlgmr.msra.gmra.mrb[2].mxu1 %vm106_vm1, %v212_v51  ;;  %2432 = vmatmul.mubr.msk.f32.vlgmr.msra.gmra.mrb[0].mxu0 %vm106_vm1, %v212_v51 }
 0x261   :  { %2524 = vmatpush1.bf16.msra.mxu0 %v3162_v47  ;;  %2556 = vmatpush1.bf16.msra.mxu1 %v3059_v8 }
 0x262   :  { %2526 = vmatprep.subr.bf16.mxu0 %v3164_v48  ;;  %2558 = vmatprep.subr.bf16.mxu1 %v3061_v9 }
 0x263   :  { %568 = vmatprep.mubr.f32.mxu0 %v2987_v3  ;;  %742 = vmatprep.mubr.f32.mxu1 %v2987_v3 }
 0x265   :  { %2528 = vmatpush1.bf16.msra.mxu0 %v3181_v53  ;;  %2560 = vmatpush1.bf16.msra.mxu1 %v3078_v14 }
 0x266   :  { %2530 = vmatprep.subr.bf16.mxu0 %v3184_v54  ;;  %2562 = vmatprep.subr.bf16.mxu1 %v3082_v15 }
 0x269   :  { %2532 = vmatpush1.bf16.msra.mxu0 %v3199_v59  ;;  %2564 = vmatpush1.bf16.msra.mxu1 %v3098_v20 }
 0x26a   :  { %2534 = vmatprep.subr.bf16.mxu0 %v3202_v60  ;;  %2566 = vmatprep.subr.bf16.mxu1 %v3102_v21 }
 0x26d   :  { %2536 = vmatpush1.bf16.msra.mxu0 %v3217_v1  ;;  %2568 = vmatpush1.bf16.msra.mxu1 %v3112_v24 }
 0x26e   :  { %2538 = vmatprep.subr.bf16.mxu0 %v3220_v2  ;;  %2570 = vmatprep.subr.bf16.mxu1 %v3151_v43 }
 0x333   :  { %v356_v57 = vpop.f32.mrb[2].mxu1  ;;  %v459_v58 = vpop.f32.mrb[0].mxu0 }
 0x334   :  { %v358_v61 = vpop.f32.mrb[3].mxu1  ;;  %v461_v62 = vpop.f32.mrb[1].mxu0  ;;  %v361_v17 = vadd.f32 %v356_v57, %v3326_v16  ;;  %v466_v18 = vrot.slane %v459_v58, 6 }
 0x335   :  { %v362_v63 = vadd.f32 %v358_v61, %v3319_v56  ;;  %v467_v0 = vrot.slane %v461_v62, 6 }
 0x336   :  { %v363_v19 = vmul.f32 0.5, %v361_v17  ;;  %v470_v25 = vadd.f32 %v466_v18, %v3135_v32 }
 0x337   :  { %2867 = vtanh.f32 %v362_v63  ;;  %v471_v5 = vadd.f32 %v467_v0, %v3124_v26  ;;  %v364_v61 = vmul.f32 0.5, %v362_v63 }
 0x338   :  { %v472_v27 = vmul.f32 0.5, %v470_v25 }
 0x339   :  { %2869 = vtanh.f32 %v471_v5  ;;  %v473_v62 = vmul.f32 0.5, %v471_v5 }
 0x33a   :  { %2871 = vtanh.f32 %v363_v19 }
 0x33b   :  { %2873 = vtanh.f32 %v472_v27 }
 0x341   :  { %v2868_v6 = vpop.eup %2867 }
 0x342   :  { %378 = vrot.lane.b32.xlu0 %v2868_v6, %s2988_s11 }
 0x343   :  { %v2870_v10 = vpop.eup %2869 }
 0x344   :  { %486 = vrot.lane.b32.xlu1 %v2870_v10, %s2988_s11  ;;  %v2872_v28 = vpop.eup %2871 }
 0x345   :  { %v367_v30 = vmul.f32 0.5, %v2872_v28  ;;  %v2874_v34 = vpop.eup %2873 }
 0x346   :  { %373 = vrot.lane.b32.xlu0 %v52_v7, %s2988_s11  ;;  %v476_v39 = vmul.f32 0.5, %v2874_v34 }
 0x347   :  { %v369_v35 = vadd.f32 0.5, %v367_v30 }
 0x348   :  { %v478_v42 = vadd.f32 0.5, %v476_v39 }
 0x34a   :  { %v484_v37 = vmul.f32 %v482_v29, %v478_v42 }
 0x3b4   :  { %v379_v38 = vpop.permute.xlu0 %378 }
 0x3b5   :  { %v381_v40 = vmul.f32 %v379_v38, %v369_v35 }
 0x3b6   :  { %v487_v44 = vpop.permute.xlu1 %486 }
 0x3b7   :  { %383 = vrot.lane.b32.xlu1 %v381_v40, %s2988_s11  ;;  %v489_v45 = vmul.f32 %v487_v44, %v478_v42 }
 0x3b8   :  { %v374_v46 = vpop.permute.xlu0 %373 }
 0x3b9   :  { %491 = vrot.lane.b32.xlu0 %v489_v45, %s2988_s11  ;;  %v376_v49 = vmul.f32 %v374_v46, %v369_v35 }
 0x429   :  { %v384_v50 = vpop.permute.xlu1 %383 }
 0x42a   :  { %v3332_v51 = vadd.f32 %v384_v50, %v376_v49 }
 0x42b   :  { %v492_v52 = vpop.permute.xlu0 %491 }
 0x42c   :  { %2875 = vtanh.f32 %v3332_v51  ;;  %v3336_v55 = vadd.f32 %v492_v52, %v484_v37 }
 0x42e   :  { %2877 = vtanh.f32 %v3336_v55 }
 0x42f   :  { %2879 = vtanh.f32 %v364_v61 }
 0x430   :  { %2881 = vtanh.f32 %v473_v62 }
 0x436   :  { %v2876_v57 = vpop.eup %2875 }
 0x437   :  { %389 = vrot.lane.b32.xlu1 %v2876_v57, %s2988_s11 }
 0x438   :  { %v2878_v58 = vpop.eup %2877 }
 0x439   :  { %497 = vrot.lane.b32.xlu0 %v2878_v58, %s2988_s11  ;;  %v2880_v0 = vpop.eup %2879 }
 0x43a   :  { %v368_v41 = vmul.f32 0.5, %v2880_v0  ;;  %v2882_v6 = vpop.eup %2881 }
 0x43b   :  { %v477_v11 = vmul.f32 0.5, %v2882_v6  ;;  %v767_v6 = vrot.slane %v3336_v55, 6 }
 0x43c   :  { %v370_v7 = vadd.f32 0.5, %v368_v41 }
 0x43d   :  { %v479_v18 = vadd.f32 0.5, %v477_v11 }
 0x4a9   :  { %v390_v10 = vpop.permute.xlu1 %389 }
 0x4aa   :  { %v392_v17 = vmul.f32 %v390_v10, %v370_v7 }
 0x4ab   :  { %v498_v19 = vpop.permute.xlu0 %497 }
 0x4ac   :  { %2433 = vmatmul.mubr.msk.f32.vlgmr.msra.gmra.mrb[2].mxu0 %vm106_vm1, %v392_v17  ;;  %v500_v63 = vmul.f32 %v498_v19, %v479_v18 }
 0x4ad   :  { %2540 = vmatpush1.bf16.msra.mxu0 %v3235_v12  ;;  %643 = vmatprep.mubr.f32.mxu0 %v2987_v3 }
 0x4ae   :  { %2542 = vmatprep.subr.bf16.mxu0 %v3238_v13  ;;  %v576_v5 = vrot.slane %v500_v63, 2 }
 0x4b0   :  { %2435 = vmatmul.mubr.msk.f32.vlgmr.msra.gmra.mrb[4].mxu1 %vm106_vm1, %v576_v5 }
 0x4b1   :  { %2544 = vmatpush1.bf16.msra.mxu0 %v3254_v22  ;;  %2572 = vmatpush1.bf16.msra.mxu1 %v3162_v47 }
 0x4b2   :  { %2546 = vmatprep.subr.bf16.mxu0 %v3258_v23  ;;  %853 = vmatprep.mubr.f32.mxu1 %v2987_v3 }
 0x4b3   :  { %2574 = vmatprep.subr.bf16.mxu1 %v3164_v48 }
 0x4b5   :  { %2548 = vmatpush1.bf16.msra.mxu0 %v3273_v31  ;;  %2576 = vmatpush1.bf16.msra.mxu1 %v3181_v53 }
 0x4b6   :  { %2550 = vmatprep.subr.bf16.mxu0 %v3276_v33  ;;  %2578 = vmatprep.subr.bf16.mxu1 %v3184_v54 }
 0x4b9   :  { %2552 = vmatpush1.bf16.msra.mxu0 %v3285_v36  ;;  %2580 = vmatpush1.bf16.msra.mxu1 %v3199_v59 }
 0x4ba   :  { %2602 = vmatprep.subr.bf16.mxu0 %v3048_v4  ;;  %2582 = vmatprep.subr.bf16.mxu1 %v3202_v60 }
 0x4bc   :  { %2434 = vmatmul.mubr.msk.f32.vlgmr.msra.gmra.mrb[2].mxu0 %vm106_vm1, %v576_v5 }
 0x4bd   :  { %2604 = vmatpush1.bf16.msra.mxu0 %v3059_v8  ;;  %1027 = vmatprep.mubr.f32.mxu0 %v2987_v3 }
 0x4be   :  { %2606 = vmatprep.subr.bf16.mxu0 %v3061_v9  ;;  %2584 = vmatpush1.bf16.msra.mxu1 %v3217_v1 }
 0x4bf   :  { %2586 = vmatprep.subr.bf16.mxu1 %v3220_v2 }
 0x4c1   :  { %2608 = vmatpush1.bf16.msra.mxu0 %v3078_v14 }
 0x4c2   :  { %2610 = vmatprep.subr.bf16.mxu0 %v3082_v15 }
 0x4c5   :  { %2612 = vmatpush1.bf16.msra.mxu0 %v3098_v20 }
 0x4c6   :  { %2614 = vmatprep.subr.bf16.mxu0 %v3102_v21 }
 0x4c9   :  { %2616 = vmatpush1.bf16.msra.mxu0 %v3112_v24 }
 0x4ca   :  { %2618 = vmatprep.subr.bf16.mxu0 %v3151_v43 }
 0x583   :  { %v744_v25 = vpop.f32.mrb[4].mxu1 }
 0x584   :  { %v746_v27 = vpop.f32.mrb[5].mxu1  ;;  %v751_v42 = vrot.slane %v744_v25, 4 }
 0x585   :  { %v752_v28 = vrot.slane %v746_v27, 4 }
 0x586   :  { %v755_v44 = vadd.f32 %v751_v42, %v3135_v32 }
 0x587   :  { %v756_v30 = vadd.f32 %v752_v28, %v3124_v26 }
 0x588   :  { %v757_v45 = vmul.f32 0.5, %v755_v44 }
 0x589   :  { %2883 = vtanh.f32 %v756_v30  ;;  %v758_v55 = vmul.f32 0.5, %v756_v30 }
 0x58f   :  { %v645_v34 = vpop.f32.mrb[2].mxu0 }
 0x590   :  { %v647_v35 = vpop.f32.mrb[3].mxu0  ;;  %v650_v46 = vadd.f32 %v645_v34, %v3326_v16 }
 0x591   :  { %v651_v38 = vadd.f32 %v647_v35, %v3319_v56 }
 0x592   :  { %v652_v49 = vmul.f32 0.5, %v650_v46 }
 0x593   :  { %2885 = vtanh.f32 %v651_v38  ;;  %v2884_v39 = vpop.eup %2883  ;;  %v653_v25 = vmul.f32 0.5, %v651_v38 }
 0x594   :  { %771 = vrot.lane.b32.xlu0 %v2884_v39, %s2988_s11  ;;  %2887 = vtanh.f32 %v757_v45 }
 0x595   :  { %2889 = vtanh.f32 %v652_v49 }
 0x59d   :  { %v2886_v40 = vpop.eup %2885 }
 0x59e   :  { %663 = vrot.lane.b32.xlu1 %v2886_v40, %s2988_s11  ;;  %v2888_v50 = vpop.eup %2887 }
 0x59f   :  { %v761_v29 = vmul.f32 0.5, %v2888_v50  ;;  %v2890_v37 = vpop.eup %2889 }
 0x5a0   :  { %v656_v61 = vmul.f32 0.5, %v2890_v37 }
 0x5a1   :  { %v763_v52 = vadd.f32 0.5, %v761_v29 }
 0x5a2   :  { %v658_v62 = vadd.f32 0.5, %v656_v61 }
 0x5a3   :  { %v769_v7 = vmul.f32 %v767_v6, %v763_v52 }
 0x5a4   :  { %v661_v17 = vmul.f32 %v658_v62, %v3332_v51 }
 0x606   :  { %v772_v57 = vpop.permute.xlu0 %771 }
 0x607   :  { %v774_v58 = vmul.f32 %v772_v57, %v763_v52 }
 0x609   :  { %776 = vrot.lane.b32.xlu0 %v774_v58, %s2988_s11 }
 0x610   :  { %v664_v0 = vpop.permute.xlu1 %663 }
 0x611   :  { %v666_v41 = vmul.f32 %v664_v0, %v658_v62 }
 0x613   :  { %668 = vrot.lane.b32.xlu1 %v666_v41, %s2988_s11 }
 0x67b   :  { %v777_v10 = vpop.permute.xlu0 %776 }
 0x67c   :  { %v3380_v11 = vadd.f32 %v777_v10, %v769_v7 }
 0x67e   :  { %2891 = vtanh.f32 %v3380_v11 }
 0x685   :  { %v669_v18 = vpop.permute.xlu1 %668 }
 0x686   :  { %v3384_v19 = vadd.f32 %v669_v18, %v661_v17 }
 0x688   :  { %2893 = vtanh.f32 %v3384_v19  ;;  %v2892_v63 = vpop.eup %2891 }
 0x689   :  { %782 = vrot.lane.b32.xlu0 %v2892_v63, %s2988_s11  ;;  %2895 = vtanh.f32 %v758_v55 }
 0x68a   :  { %2897 = vtanh.f32 %v653_v25 }
 0x692   :  { %v2894_v5 = vpop.eup %2893 }
 0x693   :  { %674 = vrot.lane.b32.xlu1 %v2894_v5, %s2988_s11  ;;  %v2896_v27 = vpop.eup %2895 }
 0x694   :  { %v762_v28 = vmul.f32 0.5, %v2896_v27  ;;  %v2898_v34 = vpop.eup %2897 }
 0x695   :  { %v657_v40 = vmul.f32 0.5, %v2898_v34 }
 0x696   :  { %v764_v35 = vadd.f32 0.5, %v762_v28 }
 0x697   :  { %v659_v44 = vadd.f32 0.5, %v657_v40 }
 0x6fb   :  { %v783_v51 = vpop.permute.xlu0 %782 }
 0x6fc   :  { %v785_v39 = vmul.f32 %v783_v51, %v764_v35 }
 0x6fe   :  { %v861_v42 = vrot.slane %v785_v39, 4 }
 0x700   :  { %2438 = vmatmul.mubr.msk.f32.vlgmr.msra.gmra.mrb[4].mxu0 %vm106_vm1, %v861_v42 }
 0x701   :  { %2620 = vmatpush1.bf16.msra.mxu0 %v3162_v47  ;;  %1138 = vmatprep.mubr.f32.mxu0 %v2987_v3 }
 0x702   :  { %2622 = vmatprep.subr.bf16.mxu0 %v3164_v48 }
 0x705   :  { %v675_v45 = vpop.permute.xlu1 %674  ;;  %2624 = vmatpush1.bf16.msra.mxu0 %v3181_v53 }
 0x706   :  { %v677_v30 = vmul.f32 %v675_v45, %v659_v44  ;;  %2626 = vmatprep.subr.bf16.mxu0 %v3184_v54 }
 0x708   :  { %2436 = vmatmul.mubr.msk.f32.vlgmr.msra.gmra.mrb[6].mxu1 %vm106_vm1, %v677_v30 }
 0x709   :  { %2588 = vmatpush1.bf16.msra.mxu1 %v3235_v12  ;;  %928 = vmatprep.mubr.f32.mxu1 %v2987_v3 }
 0x70a   :  { %2590 = vmatprep.subr.bf16.mxu1 %v3238_v13  ;;  %2628 = vmatpush1.bf16.msra.mxu0 %v3199_v59 }
 0x70b   :  { %2630 = vmatprep.subr.bf16.mxu0 %v3202_v60 }
 0x70d   :  { %2592 = vmatpush1.bf16.msra.mxu1 %v3254_v22 }
 0x70e   :  { %2594 = vmatprep.subr.bf16.mxu1 %v3258_v23  ;;  %2632 = vmatpush1.bf16.msra.mxu0 %v3217_v1 }
 0x70f   :  { %2634 = vmatprep.subr.bf16.mxu0 %v3220_v2 }
 0x711   :  { %2596 = vmatpush1.bf16.msra.mxu1 %v3273_v31 }
 0x712   :  { %2598 = vmatprep.subr.bf16.mxu1 %v3276_v33 }
 0x715   :  { %2600 = vmatpush1.bf16.msra.mxu1 %v3285_v36 }
 0x716   :  { %2650 = vmatprep.subr.bf16.mxu1 %v3048_v4 }
 0x718   :  { %2437 = vmatmul.mubr.msk.f32.vlgmr.msra.gmra.mrb[6].mxu1 %vm106_vm1, %v861_v42 }
 0x719   :  { %2652 = vmatpush1.bf16.msra.mxu1 %v3059_v8  ;;  %1317 = vmatprep.mubr.f32.mxu1 %v2987_v3 }
 0x71a   :  { %2654 = vmatprep.subr.bf16.mxu1 %v3061_v9 }
 0x71d   :  { %2656 = vmatpush1.bf16.msra.mxu1 %v3078_v14 }
 0x71e   :  { %2658 = vmatprep.subr.bf16.mxu1 %v3082_v15 }
 0x721   :  { %2660 = vmatpush1.bf16.msra.mxu1 %v3098_v20 }
 0x722   :  { %2662 = vmatprep.subr.bf16.mxu1 %v3102_v21 }
 0x725   :  { %2664 = vmatpush1.bf16.msra.mxu1 %v3112_v24 }
 0x726   :  { %2666 = vmatprep.subr.bf16.mxu1 %v3151_v43 }
 0x7d3   :  { %v1029_v38 = vpop.f32.mrb[4].mxu0 }
 0x7d4   :  { %v1031_v46 = vpop.f32.mrb[5].mxu0  ;;  %v1036_v61 = vrot.slane %v1029_v38, 2 }
 0x7d5   :  { %v1037_v49 = vrot.slane %v1031_v46, 2 }
 0x7d6   :  { %v1040_v62 = vadd.f32 %v1036_v61, %v3135_v32  ;;  %v1052_v32 = vrot.slane %v3380_v11, 6  ;;  %v3470_v61 = vld [vmem:[%s3655_s0 + $0x18] sm:$0xff] }
 0x7d7   :  { %v1041_v50 = vadd.f32 %v1037_v49, %v3124_v26 }
 0x7d8   :  { %v1042_v0 = vmul.f32 0.5, %v1040_v62 }
 0x7d9   :  { %2899 = vtanh.f32 %v1041_v50  ;;  %v1043_v11 = vmul.f32 0.5, %v1041_v50 }
 0x7e3   :  { %v2900_v29 = vpop.eup %2899 }
 0x7e4   :  { %1056 = vrot.lane.b32.xlu0 %v2900_v29, %s2988_s11 }
 0x7eb   :  { %v930_v37 = vpop.f32.mrb[6].mxu1 }
 0x7ec   :  { %v932_v52 = vpop.f32.mrb[7].mxu1  ;;  %v935_v26 = vadd.f32 %v930_v37, %v3326_v16 }
 0x7ed   :  { %v936_v57 = vadd.f32 %v932_v52, %v3319_v56 }
 0x7ee   :  { %v937_v7 = vmul.f32 0.5, %v935_v26 }
 0x7ef   :  { %2901 = vtanh.f32 %v936_v57  ;;  %v938_v38 = vmul.f32 0.5, %v936_v57 }
 0x7f0   :  { %2903 = vtanh.f32 %v1042_v0 }
 0x7f1   :  { %2905 = vtanh.f32 %v937_v7 }
 0x7f9   :  { %v2902_v58 = vpop.eup %2901 }
 0x7fa   :  { %948 = vrot.lane.b32.xlu1 %v2902_v58, %s2988_s11  ;;  %v2904_v41 = vpop.eup %2903 }
 0x7fb   :  { %v1046_v6 = vmul.f32 0.5, %v2904_v41  ;;  %v2906_v63 = vpop.eup %2905 }
 0x7fc   :  { %v941_v5 = vmul.f32 0.5, %v2906_v63 }
 0x7fd   :  { %v1048_v10 = vadd.f32 0.5, %v1046_v6 }
 0x7fe   :  { %v943_v55 = vadd.f32 0.5, %v941_v5 }
 0x7ff   :  { %v1054_v28 = vmul.f32 %v1052_v32, %v1048_v10 }
 0x800   :  { %v946_v39 = vmul.f32 %v943_v55, %v3384_v19 }
 0x856   :  { %v1057_v17 = vpop.permute.xlu0 %1056 }
 0x857   :  { %v1059_v18 = vmul.f32 %v1057_v17, %v1048_v10 }
 0x859   :  { %1061 = vrot.lane.b32.xlu0 %v1059_v18, %s2988_s11  ;;  %v3479_v18 = vld [vmem:[%s3655_s0 + $0x10] sm:$0xff] }
 0x86c   :  { %v949_v25 = vpop.permute.xlu1 %948 }
 0x86d   :  { %v951_v27 = vmul.f32 %v949_v25, %v943_v55 }
 0x86f   :  { %953 = vrot.lane.b32.xlu1 %v951_v27, %s2988_s11 }
 0x8cb   :  { %v1062_v34 = vpop.permute.xlu0 %1061 }
 0x8cc   :  { %v3428_v35 = vadd.f32 %v1062_v34, %v1054_v28 }
 0x8ce   :  { %2907 = vtanh.f32 %v3428_v35 }
 0x8d8   :  { %v2908_v51 = vpop.eup %2907 }
 0x8d9   :  { %1067 = vrot.lane.b32.xlu0 %v2908_v51, %s2988_s11 }
 0x8e1   :  { %v954_v40 = vpop.permute.xlu1 %953 }
 0x8e2   :  { %v3433_v42 = vadd.f32 %v954_v40, %v946_v39 }
 0x8e4   :  { %2909 = vtanh.f32 %v3433_v42 }
 0x8e5   :  { %2911 = vtanh.f32 %v1043_v11 }
 0x8e6   :  { %2913 = vtanh.f32 %v938_v38 }
 0x8ee   :  { %v2910_v44 = vpop.eup %2909 }
 0x8ef   :  { %959 = vrot.lane.b32.xlu1 %v2910_v44, %s2988_s11  ;;  %v2912_v45 = vpop.eup %2911 }
 0x8f0   :  { %v1047_v30 = vmul.f32 0.5, %v2912_v45  ;;  %v2914_v19 = vpop.eup %2913 }
 0x8f1   :  { %v942_v50 = vmul.f32 0.5, %v2914_v19 }
 0x8f2   :  { %v1049_v46 = vadd.f32 0.5, %v1047_v30  ;;  %v1336_v30 = vrot.slane %v3428_v35, 6 }
 0x8f3   :  { %v944_v52 = vadd.f32 0.5, %v942_v50 }
 0x94b   :  { %v1068_v49 = vpop.permute.xlu0 %1067 }
 0x94c   :  { %v1070_v29 = vmul.f32 %v1068_v49, %v1049_v46 }
 0x94e   :  { %v1146_v37 = vrot.slane %v1070_v29, 6 }
 0x950   :  { %2443 = vmatmul.mubr.msk.f32.vlgmr.msra.gmra.mrb[8].mxu1 %vm106_vm1, %v1146_v37 }
 0x951   :  { %2668 = vmatpush1.bf16.msra.mxu1 %v3162_v47  ;;  %1422 = vmatprep.mubr.f32.mxu1 %v2987_v3 }
 0x952   :  { %2670 = vmatprep.subr.bf16.mxu1 %v3164_v48 }
 0x955   :  { %2672 = vmatpush1.bf16.msra.mxu1 %v3181_v53 }
 0x956   :  { %2674 = vmatprep.subr.bf16.mxu1 %v3184_v54 }
 0x959   :  { %2676 = vmatpush1.bf16.msra.mxu1 %v3199_v59 }
 0x95a   :  { %2678 = vmatprep.subr.bf16.mxu1 %v3202_v60 }
 0x95d   :  { %2680 = vmatpush1.bf16.msra.mxu1 %v3217_v1 }
 0x95e   :  { %2682 = vmatprep.subr.bf16.mxu1 %v3220_v2 }
 0x961   :  { %v960_v57 = vpop.permute.xlu1 %959 }
 0x962   :  { %v962_v58 = vmul.f32 %v960_v57, %v944_v52 }
 0x964   :  { %2439 = vmatmul.mubr.msk.f32.vlgmr.msra.gmra.mrb[6].mxu0 %vm106_vm1, %v962_v58 }
 0x965   :  { %2636 = vmatpush1.bf16.msra.mxu0 %v3235_v12  ;;  %1213 = vmatprep.mubr.f32.mxu0 %v2987_v3 }
 0x966   :  { %2638 = vmatprep.subr.bf16.mxu0 %v3238_v13 }
 0x969   :  { %2640 = vmatpush1.bf16.msra.mxu0 %v3254_v22 }
 0x96a   :  { %2642 = vmatprep.subr.bf16.mxu0 %v3258_v23 }
 0x96d   :  { %2644 = vmatpush1.bf16.msra.mxu0 %v3273_v31 }
 0x96e   :  { %2646 = vmatprep.subr.bf16.mxu0 %v3276_v33 }
 0x971   :  { %2648 = vmatpush1.bf16.msra.mxu0 %v3285_v36 }
 0x972   :  { %2698 = vmatprep.subr.bf16.mxu0 %v3048_v4 }
 0x974   :  { %2440 = vmatmul.mubr.msk.f32.vlgmr.msra.gmra.mrb[6].mxu0 %vm106_vm1, %v1146_v37 }
 0x975   :  { %2700 = vmatpush1.bf16.msra.mxu0 %v3059_v8  ;;  %1595 = vmatprep.mubr.f32.mxu0 %v2987_v3 }
 0x976   :  { %2702 = vmatprep.subr.bf16.mxu0 %v3061_v9 }
 0x979   :  { %2704 = vmatpush1.bf16.msra.mxu0 %v3078_v14 }
 0x97a   :  { %2706 = vmatprep.subr.bf16.mxu0 %v3082_v15 }
 0x97d   :  { %2708 = vmatpush1.bf16.msra.mxu0 %v3098_v20 }
 0x97e   :  { %2710 = vmatprep.subr.bf16.mxu0 %v3102_v21 }
 0x981   :  { %2712 = vmatpush1.bf16.msra.mxu0 %v3112_v24 }
 0x982   :  { %2714 = vmatprep.subr.bf16.mxu0 %v3151_v43 }
 0xa23   :  { %v1319_v62 = vpop.f32.mrb[8].mxu1 }
 0xa24   :  { %v1321_v0 = vpop.f32.mrb[9].mxu1  ;;  %v1324_v63 = vadd.f32 %v3479_v18, %v1319_v62 }
 0xa25   :  { %v1325_v41 = vadd.f32 %v3470_v61, %v1321_v0 }
 0xa26   :  { %v1326_v5 = vmul.f32 0.5, %v1324_v63 }
 0xa27   :  { %2915 = vtanh.f32 %v1325_v41  ;;  %v1327_v35 = vmul.f32 0.5, %v1325_v41 }
 0xa31   :  { %v2916_v26 = vpop.eup %2915 }
 0xa32   :  { %1340 = vrot.lane.b32.xlu0 %v2916_v26, %s2988_s11 }
 0xa47   :  { %v1215_v6 = vpop.f32.mrb[6].mxu0 }
 0xa48   :  { %v1217_v7 = vpop.f32.mrb[7].mxu0  ;;  %v1220_v34 = vadd.f32 %v1215_v6, %v3326_v16 }
 0xa49   :  { %v1221_v10 = vadd.f32 %v1217_v7, %v3319_v56 }
 0xa4a   :  { %v1222_v51 = vmul.f32 0.5, %v1220_v34 }
 0xa4b   :  { %2917 = vtanh.f32 %v1221_v10 }
 0xa4c   :  { %2919 = vtanh.f32 %v1326_v5 }
 0xa4d   :  { %2921 = vtanh.f32 %v1222_v51 }
 0xa55   :  { %v2918_v17 = vpop.eup %2917 }
 0xa56   :  { %1233 = vrot.lane.b32.xlu1 %v2918_v17, %s2988_s11  ;;  %v2920_v55 = vpop.eup %2919 }
 0xa57   :  { %v1330_v25 = vmul.f32 0.5, %v2920_v55  ;;  %v2922_v39 = vpop.eup %2921 }
 0xa58   :  { %v1226_v40 = vmul.f32 0.5, %v2922_v39 }
 0xa59   :  { %v1332_v27 = vadd.f32 0.5, %v1330_v25 }
 0xa5a   :  { %v1228_v44 = vadd.f32 0.5, %v1226_v40 }
 0xa5b   :  { %v1338_v38 = vmul.f32 %v1336_v30, %v1332_v27 }
 0xa5c   :  { %v1231_v37 = vmul.f32 %v1228_v44, %v3433_v42  ;;  %v1223_v42 = vmul.f32 0.5, %v1221_v10 }
 0xaa4   :  { %v1341_v32 = vpop.permute.xlu0 %1340 }
 0xaa5   :  { %v1343_v28 = vmul.f32 %v1341_v32, %v1332_v27 }
 0xaa7   :  { %1345 = vrot.lane.b32.xlu0 %v1343_v28, %s2988_s11 }
 0xac8   :  { %v1234_v11 = vpop.permute.xlu1 %1233 }
 0xac9   :  { %v1236_v45 = vmul.f32 %v1234_v11, %v1228_v44 }
 0xacb   :  { %1238 = vrot.lane.b32.xlu1 %v1236_v45, %s2988_s11 }
 0xb19   :  { %v1346_v46 = vpop.permute.xlu0 %1345 }
 0xb1a   :  { %v3486_v49 = vadd.f32 %v1346_v46, %v1338_v38 }
 0xb1c   :  { %2923 = vtanh.f32 %v3486_v49 }
 0xb26   :  { %v2924_v29 = vpop.eup %2923 }
 0xb27   :  { %1351 = vrot.lane.b32.xlu0 %v2924_v29, %s2988_s11 }
 0xb3d   :  { %v1239_v19 = vpop.permute.xlu1 %1238 }
 0xb3e   :  { %v3491_v50 = vadd.f32 %v1239_v19, %v1231_v37 }
 0xb40   :  { %2925 = vtanh.f32 %v3491_v50 }
 0xb41   :  { %2927 = vtanh.f32 %v1327_v35 }
 0xb42   :  { %2929 = vtanh.f32 %v1223_v42 }
 0xb4a   :  { %v2926_v52 = vpop.eup %2925 }
 0xb4b   :  { %1244 = vrot.lane.b32.xlu1 %v2926_v52, %s2988_s11  ;;  %v2928_v57 = vpop.eup %2927 }
 0xb4c   :  { %v1331_v58 = vmul.f32 0.5, %v2928_v57  ;;  %v2930_v41 = vpop.eup %2929 }
 0xb4d   :  { %v1227_v6 = vmul.f32 0.5, %v2930_v41 }
 0xb4e   :  { %v1333_v62 = vadd.f32 0.5, %v1331_v58 }
 0xb4f   :  { %v1229_v7 = vadd.f32 0.5, %v1227_v6 }
 0xb99   :  { %v1352_v0 = vpop.permute.xlu0 %1351 }
 0xb9a   :  { %v1354_v26 = vmul.f32 %v1352_v0, %v1333_v62  ;;  %v1620_v62 = vrot.slane %v3486_v49, 6 }
 0xb9c   :  { %2446 = vmatmul.mubr.msk.f32.vlgmr.msra.gmra.mrb[8].mxu0 %vm106_vm1, %v1354_v26 }
 0xb9d   :  { %2716 = vmatpush1.bf16.msra.mxu0 %v3162_v47  ;;  %1706 = vmatprep.mubr.f32.mxu0 %v2987_v3 }
 0xb9e   :  { %2718 = vmatprep.subr.bf16.mxu0 %v3164_v48 }
 0xba1   :  { %2720 = vmatpush1.bf16.msra.mxu0 %v3181_v53 }
 0xba2   :  { %2722 = vmatprep.subr.bf16.mxu0 %v3184_v54 }
 0xba5   :  { %2724 = vmatpush1.bf16.msra.mxu0 %v3199_v59 }
 0xba6   :  { %2726 = vmatprep.subr.bf16.mxu0 %v3202_v60 }
 0xba9   :  { %2728 = vmatpush1.bf16.msra.mxu0 %v3217_v1 }
 0xbaa   :  { %2730 = vmatprep.subr.bf16.mxu0 %v3220_v2 }
 0xbbd   :  { %v1245_v17 = vpop.permute.xlu1 %1244 }
 0xbbe   :  { %v1247_v63 = vmul.f32 %v1245_v17, %v1229_v7 }
 0xbc0   :  { %2444 = vmatmul.mubr.msk.f32.vlgmr.msra.gmra.mrb[10].mxu1 %vm106_vm1, %v1247_v63 }
 0xbc1   :  { %2684 = vmatpush1.bf16.msra.mxu1 %v3235_v12  ;;  %1496 = vmatprep.mubr.f32.mxu1 %v2987_v3 }
 0xbc2   :  { %2686 = vmatprep.subr.bf16.mxu1 %v3238_v13 }
 0xbc5   :  { %2688 = vmatpush1.bf16.msra.mxu1 %v3254_v22 }
 0xbc6   :  { %2690 = vmatprep.subr.bf16.mxu1 %v3258_v23 }
 0xbc9   :  { %2692 = vmatpush1.bf16.msra.mxu1 %v3273_v31 }
 0xbca   :  { %2694 = vmatprep.subr.bf16.mxu1 %v3276_v33 }
 0xbcd   :  { %2696 = vmatpush1.bf16.msra.mxu1 %v3285_v36 }
 0xbce   :  { %2746 = vmatprep.subr.bf16.mxu1 %v3048_v4 }
 0xbd0   :  { %2445 = vmatmul.mubr.msk.f32.vlgmr.msra.gmra.mrb[10].mxu1 %vm106_vm1, %v1354_v26 }
 0xbd1   :  { %2748 = vmatpush1.bf16.msra.mxu1 %v3059_v8  ;;  %1880 = vmatprep.mubr.f32.mxu1 %v2987_v3 }
 0xbd2   :  { %2750 = vmatprep.subr.bf16.mxu1 %v3061_v9 }
 0xbd5   :  { %2752 = vmatpush1.bf16.msra.mxu1 %v3078_v14 }
 0xbd6   :  { %2754 = vmatprep.subr.bf16.mxu1 %v3082_v15 }
 0xbd9   :  { %2756 = vmatpush1.bf16.msra.mxu1 %v3098_v20 }
 0xbda   :  { %2758 = vmatprep.subr.bf16.mxu1 %v3102_v21 }
 0xbdd   :  { %2760 = vmatpush1.bf16.msra.mxu1 %v3112_v24 }
 0xbde   :  { %2762 = vmatprep.subr.bf16.mxu1 %v3151_v43 }
 0xc6f   :  { %v1597_v10 = vpop.f32.mrb[8].mxu0 }
 0xc70   :  { %v1599_v5 = vpop.f32.mrb[9].mxu0  ;;  %v1604_v39 = vrot.slane %v1597_v10, 6 }
 0xc71   :  { %v1605_v55 = vrot.slane %v1599_v5, 6 }
 0xc72   :  { %v1608_v40 = vadd.f32 %v3479_v18, %v1604_v39 }
 0xc73   :  { %v1609_v25 = vadd.f32 %v3470_v61, %v1605_v55 }
 0xc74   :  { %v1610_v44 = vmul.f32 0.5, %v1608_v40 }
 0xc75   :  { %2931 = vtanh.f32 %v1609_v25  ;;  %v1611_v49 = vmul.f32 0.5, %v1609_v25 }
 0xc7f   :  { %v2932_v27 = vpop.eup %2931 }
 0xc80   :  { %1624 = vrot.lane.b32.xlu0 %v2932_v27, %s2988_s11 }
 0xca3   :  { %v1498_v32 = vpop.f32.mrb[10].mxu1 }
 0xca4   :  { %v1500_v28 = vpop.f32.mrb[11].mxu1  ;;  %v1503_v29 = vadd.f32 %v1498_v32, %v3326_v16 }
 0xca5   :  { %v1504_v34 = vadd.f32 %v1500_v28, %v3319_v56 }
 0xca6   :  { %v1505_v37 = vmul.f32 0.5, %v1503_v29 }
 0xca7   :  { %2933 = vtanh.f32 %v1504_v34 }
 0xca8   :  { %2935 = vtanh.f32 %v1610_v44 }
 0xca9   :  { %2937 = vtanh.f32 %v1505_v37 }
 0xcb1   :  { %v2934_v51 = vpop.eup %2933 }
 0xcb2   :  { %1516 = vrot.lane.b32.xlu1 %v2934_v51, %s2988_s11  ;;  %v2936_v11 = vpop.eup %2935 }
 0xcb3   :  { %v1614_v45 = vmul.f32 0.5, %v2936_v11  ;;  %v2938_v19 = vpop.eup %2937 }
 0xcb4   :  { %v1509_v52 = vmul.f32 0.5, %v2938_v19 }
 0xcb5   :  { %v1616_v30 = vadd.f32 0.5, %v1614_v45 }
 0xcb6   :  { %v1511_v35 = vadd.f32 0.5, %v1509_v52 }
 0xcb7   :  { %v1622_v0 = vmul.f32 %v1620_v62, %v1616_v30 }
 0xcb8   :  { %v1514_v6 = vmul.f32 %v1511_v35, %v3491_v50  ;;  %v1506_v50 = vmul.f32 0.5, %v1504_v34 }
 0xcf2   :  { %v1625_v38 = vpop.permute.xlu0 %1624 }
 0xcf3   :  { %v1627_v46 = vmul.f32 %v1625_v38, %v1616_v30 }
 0xcf5   :  { %1629 = vrot.lane.b32.xlu0 %v1627_v46, %s2988_s11 }
 0xd24   :  { %v1517_v57 = vpop.permute.xlu1 %1516 }
 0xd25   :  { %v1519_v58 = vmul.f32 %v1517_v57, %v1511_v35 }
 0xd27   :  { %1521 = vrot.lane.b32.xlu1 %v1519_v58, %s2988_s11 }
 0xd67   :  { %v1630_v26 = vpop.permute.xlu0 %1629 }
 0xd68   :  { %v3534_v42 = vadd.f32 %v1630_v26, %v1622_v0 }
 0xd6a   :  { %2939 = vtanh.f32 %v3534_v42  ;;  %v1905_v26 = vrot.slane %v3534_v42, 6 }
 0xd74   :  { %v2940_v41 = vpop.eup %2939 }
 0xd75   :  { %1635 = vrot.lane.b32.xlu0 %v2940_v41, %s2988_s11 }
 0xd99   :  { %v1522_v7 = vpop.permute.xlu1 %1521 }
 0xd9a   :  { %v3539_v17 = vadd.f32 %v1522_v7, %v1514_v6 }
 0xd9c   :  { %2941 = vtanh.f32 %v3539_v17 }
 0xd9d   :  { %2943 = vtanh.f32 %v1611_v49 }
 0xd9e   :  { %2945 = vtanh.f32 %v1506_v50 }
 0xda6   :  { %v2942_v63 = vpop.eup %2941 }
 0xda7   :  { %1527 = vrot.lane.b32.xlu1 %v2942_v63, %s2988_s11  ;;  %v2944_v10 = vpop.eup %2943 }
 0xda8   :  { %v1615_v5 = vmul.f32 0.5, %v2944_v10  ;;  %v2946_v25 = vpop.eup %2945 }
 0xda9   :  { %v1510_v51 = vmul.f32 0.5, %v2946_v25 }
 0xdaa   :  { %v1617_v55 = vadd.f32 0.5, %v1615_v5 }
 0xdab   :  { %v1512_v39 = vadd.f32 0.5, %v1510_v51 }
 0xde7   :  { %v1636_v27 = vpop.permute.xlu0 %1635 }
 0xde8   :  { %v1638_v32 = vmul.f32 %v1636_v27, %v1617_v55 }
 0xdea   :  { %v1714_v28 = vrot.slane %v1638_v32, 2 }
 0xdec   :  { %2449 = vmatmul.mubr.msk.f32.vlgmr.msra.gmra.mrb[12].mxu1 %vm106_vm1, %v1714_v28 }
 0xded   :  { %2764 = vmatpush1.bf16.msra.mxu1 %v3162_v47  ;;  %1991 = vmatprep.mubr.f32.mxu1 %v2987_v3 }
 0xdee   :  { %2766 = vmatprep.subr.bf16.mxu1 %v3164_v48 }
 0xdf1   :  { %2768 = vmatpush1.bf16.msra.mxu1 %v3181_v53 }
 0xdf2   :  { %2770 = vmatprep.subr.bf16.mxu1 %v3184_v54 }
 0xdf5   :  { %2772 = vmatpush1.bf16.msra.mxu1 %v3199_v59 }
 0xdf6   :  { %2774 = vmatprep.subr.bf16.mxu1 %v3202_v60 }
 0xdf9   :  { %2776 = vmatpush1.bf16.msra.mxu1 %v3217_v1 }
 0xdfa   :  { %2778 = vmatprep.subr.bf16.mxu1 %v3220_v2 }
 0xe19   :  { %v1528_v40 = vpop.permute.xlu1 %1527 }
 0xe1a   :  { %v1530_v44 = vmul.f32 %v1528_v40, %v1512_v39 }
 0xe1c   :  { %2447 = vmatmul.mubr.msk.f32.vlgmr.msra.gmra.mrb[10].mxu0 %vm106_vm1, %v1530_v44 }
 0xe1d   :  { %2732 = vmatpush1.bf16.msra.mxu0 %v3235_v12  ;;  %1781 = vmatprep.mubr.f32.mxu0 %v2987_v3 }
 0xe1e   :  { %2734 = vmatprep.subr.bf16.mxu0 %v3238_v13 }
 0xe21   :  { %2736 = vmatpush1.bf16.msra.mxu0 %v3254_v22 }
 0xe22   :  { %2738 = vmatprep.subr.bf16.mxu0 %v3258_v23 }
 0xe25   :  { %2740 = vmatpush1.bf16.msra.mxu0 %v3273_v31 }
 0xe26   :  { %2742 = vmatprep.subr.bf16.mxu0 %v3276_v33 }
 0xe29   :  { %2744 = vmatpush1.bf16.msra.mxu0 %v3285_v36 }
 0xe2a   :  { %2794 = vmatprep.subr.bf16.mxu0 %v3048_v4 }
 0xe2c   :  { %2448 = vmatmul.mubr.msk.f32.vlgmr.msra.gmra.mrb[10].mxu0 %vm106_vm1, %v1714_v28 }
 0xe2d   :  { %2796 = vmatpush1.bf16.msra.mxu0 %v3059_v8  ;;  %2165 = vmatprep.mubr.f32.mxu0 %v2987_v3 }
 0xe2e   :  { %2798 = vmatprep.subr.bf16.mxu0 %v3061_v9 }
 0xe31   :  { %2800 = vmatpush1.bf16.msra.mxu0 %v3078_v14 }
 0xe32   :  { %2802 = vmatprep.subr.bf16.mxu0 %v3082_v15 }
 0xe35   :  { %2804 = vmatpush1.bf16.msra.mxu0 %v3098_v20 }
 0xe36   :  { %2806 = vmatprep.subr.bf16.mxu0 %v3102_v21 }
 0xe39   :  { %2808 = vmatpush1.bf16.msra.mxu0 %v3112_v24 }
 0xe3a   :  { %2810 = vmatprep.subr.bf16.mxu0 %v3151_v43 }
 0xebf   :  { %v1882_v4 = vpop.f32.mrb[12].mxu1 }
 0xec0   :  { %v1884_v34 = vpop.f32.mrb[13].mxu1  ;;  %v1889_v21 = vrot.slane %v1882_v4, 4 }
 0xec1   :  { %v1890_v11 = vrot.slane %v1884_v34, 4 }
 0xec2   :  { %v1893_v24 = vadd.f32 %v3479_v18, %v1889_v21 }
 0xec3   :  { %v1894_v8 = vadd.f32 %v3470_v61, %v1890_v11 }
 0xec4   :  { %v1895_v43 = vmul.f32 0.5, %v1893_v24 }
 0xec5   :  { %2947 = vtanh.f32 %v1894_v8  ;;  %v1896_v42 = vmul.f32 0.5, %v1894_v8 }
 0xecf   :  { %v2948_v45 = vpop.eup %2947 }
 0xed0   :  { %1909 = vrot.lane.b32.xlu0 %v2948_v45, %s2988_s11 }
 0xeff   :  { %v1783_v9 = vpop.f32.mrb[10].mxu0 }
 0xf00   :  { %v1785_v14 = vpop.f32.mrb[11].mxu0  ;;  %v1788_v19 = vadd.f32 %v1783_v9, %v3326_v16 }
 0xf01   :  { %v1789_v15 = vadd.f32 %v1785_v14, %v3319_v56 }
 0xf02   :  { %v1790_v52 = vmul.f32 0.5, %v1788_v19 }
 0xf03   :  { %2949 = vtanh.f32 %v1789_v15 }
 0xf04   :  { %2951 = vtanh.f32 %v1895_v43 }
 0xf05   :  { %2953 = vtanh.f32 %v1790_v52 }
 0xf0d   :  { %v2950_v20 = vpop.eup %2949 }
 0xf0e   :  { %1801 = vrot.lane.b32.xlu1 %v2950_v20, %s2988_s11  ;;  %v2952_v30 = vpop.eup %2951 }
 0xf0f   :  { %v1899_v38 = vmul.f32 0.5, %v2952_v30  ;;  %v2954_v35 = vpop.eup %2953 }
 0xf10   :  { %v1794_v57 = vmul.f32 0.5, %v2954_v35 }
 0xf11   :  { %v1901_v46 = vadd.f32 0.5, %v1899_v38 }
 0xf12   :  { %v1796_v58 = vadd.f32 0.5, %v1794_v57 }
 0xf13   :  { %v1907_v41 = vmul.f32 %v1905_v26, %v1901_v46 }
 0xf14   :  { %v1799_v49 = vmul.f32 %v1796_v58, %v3539_v17  ;;  %v1791_v17 = vmul.f32 0.5, %v1789_v15 }
 0xf42   :  { %v1910_v29 = vpop.permute.xlu0 %1909 }
 0xf43   :  { %v1912_v37 = vmul.f32 %v1910_v29, %v1901_v46 }
 0xf45   :  { %1914 = vrot.lane.b32.xlu0 %v1912_v37, %s2988_s11 }
 0xf80   :  { %v1802_v62 = vpop.permute.xlu1 %1801 }
 0xf81   :  { %v1804_v0 = vmul.f32 %v1802_v62, %v1796_v58 }
 0xf83   :  { %1806 = vrot.lane.b32.xlu1 %v1804_v0, %s2988_s11 }
 0xfb7   :  { %v1915_v6 = vpop.permute.xlu0 %1914 }
 0xfb8   :  { %v3582_v7 = vadd.f32 %v1915_v6, %v1907_v41 }
 0xfba   :  { %2955 = vtanh.f32 %v3582_v7 }
 0xfc4   :  { %v2956_v63 = vpop.eup %2955 }
 0xfc5   :  { %1920 = vrot.lane.b32.xlu0 %v2956_v63, %s2988_s11 }
 0xff5   :  { %v1807_v10 = vpop.permute.xlu1 %1806 }
 0xff6   :  { %v3587_v5 = vadd.f32 %v1807_v10, %v1799_v49 }
 0xff8   :  { %2957 = vtanh.f32 %v3587_v5 }
 0xff9   :  { %2959 = vtanh.f32 %v1896_v42 }
 0xffa   :  { %2961 = vtanh.f32 %v1791_v17 }
0x1002   :  { %v2958_v55 = vpop.eup %2957 }
0x1003   :  { %1812 = vrot.lane.b32.xlu1 %v2958_v55, %s2988_s11  ;;  %v2960_v27 = vpop.eup %2959 }
0x1004   :  { %v1900_v32 = vmul.f32 0.5, %v2960_v27  ;;  %v2962_v39 = vpop.eup %2961 }
0x1006   :  { %v1902_v28 = vadd.f32 0.5, %v1900_v32 }
0x1037   :  { %v1921_v50 = vpop.permute.xlu0 %1920 }
0x1038   :  { %v1923_v25 = vmul.f32 %v1921_v50, %v1902_v28 }
0x103a   :  { %v1999_v51 = vrot.slane %v1923_v25, 4 }
0x103c   :  { %2452 = vmatmul.mubr.msk.f32.vlgmr.msra.gmra.mrb[12].mxu0 %vm106_vm1, %v1999_v51 }
0x103d   :  { %2812 = vmatpush1.bf16.msra.mxu0 %v3162_v47  ;;  %2276 = vmatprep.mubr.f32.mxu0 %v2987_v3  ;;  %v1795_v47 = vmul.f32 0.5, %v2962_v39 }
0x103e   :  { %2814 = vmatprep.subr.bf16.mxu0 %v3164_v48 }
0x103f   :  { %v1797_v40 = vadd.f32 0.5, %v1795_v47 }
0x1041   :  { %2816 = vmatpush1.bf16.msra.mxu0 %v3181_v53 }
0x1042   :  { %2818 = vmatprep.subr.bf16.mxu0 %v3184_v54 }
0x1045   :  { %2820 = vmatpush1.bf16.msra.mxu0 %v3199_v59 }
0x1046   :  { %2822 = vmatprep.subr.bf16.mxu0 %v3202_v60 }
0x1049   :  { %2824 = vmatpush1.bf16.msra.mxu0 %v3217_v1 }
0x104a   :  { %2826 = vmatprep.subr.bf16.mxu0 %v3220_v2 }
0x1075   :  { %v1813_v44 = vpop.permute.xlu1 %1812 }
0x1076   :  { %v1815_v4 = vmul.f32 %v1813_v44, %v1797_v40 }
0x1078   :  { %2450 = vmatmul.mubr.msk.f32.vlgmr.msra.gmra.mrb[14].mxu1 %vm106_vm1, %v1815_v4 }
0x1079   :  { %2780 = vmatpush1.bf16.msra.mxu1 %v3235_v12  ;;  %2066 = vmatprep.mubr.f32.mxu1 %v2987_v3 }
0x107a   :  { %2782 = vmatprep.subr.bf16.mxu1 %v3238_v13 }
0x107d   :  { %2784 = vmatpush1.bf16.msra.mxu1 %v3254_v22 }
0x107e   :  { %2786 = vmatprep.subr.bf16.mxu1 %v3258_v23 }
0x1081   :  { %2788 = vmatpush1.bf16.msra.mxu1 %v3273_v31 }
0x1082   :  { %2790 = vmatprep.subr.bf16.mxu1 %v3276_v33 }
0x1085   :  { %2792 = vmatpush1.bf16.msra.mxu1 %v3285_v36 }
0x1088   :  { %2451 = vmatmul.mubr.msk.f32.vlgmr.msra.gmra.mrb[14].mxu1 %vm106_vm1, %v1999_v51 }
0x110f   :  { %v2167_v48 = vpop.f32.mrb[12].mxu0 }
0x1110   :  { %v2169_v53 = vpop.f32.mrb[13].mxu0  ;;  %v2174_v8 = vrot.slane %v2167_v48, 2 }
0x1111   :  { %v2175_v54 = vrot.slane %v2169_v53, 2 }
0x1112   :  { %v2178_v45 = vadd.f32 %v3479_v18, %v2174_v8  ;;  %v2190_v18 = vrot.slane %v3582_v7, 6 }
0x1113   :  { %v2179_v59 = vadd.f32 %v3470_v61, %v2175_v54 }
0x1114   :  { %v2180_v9 = vmul.f32 0.5, %v2178_v45 }
0x1115   :  { %2963 = vtanh.f32 %v2179_v59  ;;  %v2181_v41 = vmul.f32 0.5, %v2179_v59  ;;  %v2455_v59 = vld [vmem:[%s3660_s5] ss:$0 sm:$0xff] }
0x111f   :  { %v2964_v60 = vpop.eup %2963 }
0x1120   :  { %2194 = vrot.lane.b32.xlu0 %v2964_v60, %s2988_s11 }
0x115b   :  { %v2068_v1 = vpop.f32.mrb[14].mxu1 }
0x115c   :  { %v2070_v2 = vpop.f32.mrb[15].mxu1  ;;  %v2073_v24 = vadd.f32 %v2068_v1, %v3326_v16 }
0x115d   :  { %v2074_v34 = vadd.f32 %v2070_v2, %v3319_v56 }
0x115e   :  { %v2075_v43 = vmul.f32 0.5, %v2073_v24 }
0x115f   :  { %2965 = vtanh.f32 %v2074_v34  ;;  %v2076_v55 = vmul.f32 0.5, %v2074_v34 }
0x1160   :  { %2967 = vtanh.f32 %v2180_v9 }
0x1161   :  { %2969 = vtanh.f32 %v2075_v43 }
0x1169   :  { %v2966_v11 = vpop.eup %2965 }
0x116a   :  { %2086 = vrot.lane.b32.xlu1 %v2966_v11, %s2988_s11  ;;  %v2968_v14 = vpop.eup %2967 }
0x116b   :  { %v2184_v15 = vmul.f32 0.5, %v2968_v14  ;;  %v2970_v30 = vpop.eup %2969 }
0x116c   :  { %v2079_v38 = vmul.f32 0.5, %v2970_v30 }
0x116d   :  { %v2186_v61 = vadd.f32 0.5, %v2184_v15 }
0x116e   :  { %v2081_v46 = vadd.f32 0.5, %v2079_v38 }
0x116f   :  { %v2192_v19 = vmul.f32 %v2190_v18, %v2186_v61 }
0x1170   :  { %v2084_v58 = vmul.f32 %v2081_v46, %v3587_v5 }
0x1192   :  { %v2195_v20 = vpop.permute.xlu0 %2194 }
0x1193   :  { %v2197_v21 = vmul.f32 %v2195_v20, %v2186_v61 }
0x1195   :  { %2199 = vrot.lane.b32.xlu0 %v2197_v21, %s2988_s11 }
0x11dc   :  { %v2087_v29 = vpop.permute.xlu1 %2086 }
0x11dd   :  { %v2089_v37 = vmul.f32 %v2087_v29, %v2081_v46 }
0x11df   :  { %2091 = vrot.lane.b32.xlu1 %v2089_v37, %s2988_s11 }
0x1207   :  { %v2200_v52 = vpop.permute.xlu0 %2199 }
0x1208   :  { %v2202_v35 = vadd.f32 %v2200_v52, %v2192_v19 }
0x120a   :  { %2971 = vtanh.f32 %v2202_v35 }
0x1214   :  { %v2972_v57 = vpop.eup %2971 }
0x1215   :  { %2205 = vrot.lane.b32.xlu0 %v2972_v57, %s2988_s11 }
0x1251   :  { %v2092_v62 = vpop.permute.xlu1 %2091 }
0x1252   :  { %v2094_v0 = vadd.f32 %v2092_v62, %v2084_v58 }
0x1254   :  { %2973 = vtanh.f32 %v2094_v0 }
0x1255   :  { %2975 = vtanh.f32 %v2181_v41 }
0x1256   :  { %2977 = vtanh.f32 %v2076_v55 }
0x125e   :  { %v2974_v26 = vpop.eup %2973 }
0x125f   :  { %2097 = vrot.lane.b32.xlu1 %v2974_v26, %s2988_s11  ;;  %v2976_v6 = vpop.eup %2975 }
0x1260   :  { %v2185_v63 = vmul.f32 0.5, %v2976_v6  ;;  %v2978_v42 = vpop.eup %2977 }
0x1261   :  { %v2080_v5 = vmul.f32 0.5, %v2978_v42 }
0x1262   :  { %v2187_v7 = vadd.f32 0.5, %v2185_v63 }
0x1263   :  { %v2082_v27 = vadd.f32 0.5, %v2080_v5 }
0x1287   :  { %v2206_v49 = vpop.permute.xlu0 %2205 }
0x1288   :  { %v2208_v10 = vmul.f32 %v2206_v49, %v2187_v7 }
0x128a   :  { %2387 = vst.msk [vmem:[#allocation2 - $0x6] sm:$0xc0] %vm2386_vm2, %v2208_v10  ;;  %v2284_v50 = vrot.slane %v2208_v10, 6 }
0x12d1   :  { %v2098_v32 = vpop.permute.xlu1 %2097 }
0x12d2   :  { %v2100_v28 = vmul.f32 %v2098_v32, %v2082_v27 }
0x12d4   :  { %2453 = vmatmul.mubr.msk.f32.vlgmr.msra.gmra.mrb[14].mxu0 %vm106_vm1, %v2100_v28 }
0x12d5   :  { %2828 = vmatpush1.bf16.msra.mxu0 %v3235_v12  ;;  %2351 = vmatprep.mubr.f32.mxu0 %v2987_v3 }
0x12d6   :  { %2830 = vmatprep.subr.bf16.mxu0 %v3238_v13 }
0x12d9   :  { %2832 = vmatpush1.bf16.msra.mxu0 %v3254_v22 }
0x12da   :  { %2834 = vmatprep.subr.bf16.mxu0 %v3258_v23 }
0x12dd   :  { %2836 = vmatpush1.bf16.msra.mxu0 %v3273_v31 }
0x12de   :  { %2838 = vmatprep.subr.bf16.mxu0 %v3276_v33 }
0x12e1   :  { %2840 = vmatpush1.bf16.msra.mxu0 %v3285_v36 }
0x12e4   :  { %2454 = vmatmul.mubr.msk.f32.vlgmr.msra.gmra.mrb[14].mxu0 %vm106_vm1, %v2284_v50 }
0x13b7   :  { %v2353_v25 = vpop.f32.mrb[14].mxu0 }
0x13b8   :  { %v2355_v51 = vpop.f32.mrb[15].mxu0  ;;  %v2358_v13 = vadd.f32 %v2353_v25, %v3326_v16 }
0x13b9   :  { %v2359_v12 = vadd.f32 %v2355_v51, %v3319_v56  ;;  %v12_v56 = vstv %s3659_s6 }
0x13ba   :  { %v2360_v22 = vmul.f32 0.5, %v2358_v13  ;;  %13 = vst [vmem:[#allocation6] sm:$0x1] %v12_v56 }
0x13bb   :  { %2979 = vtanh.f32 %v2359_v12  ;;  %v2361_v16 = vmul.f32 0.5, %v2359_v12 }
0x13bc   :  { %2981 = vtanh.f32 %v2360_v22 }
0x13c1   :  { %v2456_v8 = vld [vmem:[#allocation6] ss:$0 sm:$0xff] }
0x13c5   :  { %v2980_v3 = vpop.eup %2979 }
0x13c6   :  { %2371 = vrot.lane.b32.xlu1 %v2980_v3, %s2988_s11  ;;  %v2982_v23 = vpop.eup %2981 }
0x13c7   :  { %v2364_v31 = vmul.f32 0.5, %v2982_v23 }
0x13c9   :  { %v2366_v33 = vadd.f32 0.5, %v2364_v31 }
0x13cb   :  { %v2369_v39 = vmul.f32 %v2366_v33, %v2094_v0 }
0x1438   :  { %v2372_v17 = vpop.permute.xlu1 %2371 }
0x1439   :  { %v2374_v36 = vmul.f32 %v2372_v17, %v2366_v33 }
0x143b   :  { %2376 = vrot.lane.b32.xlu0 %v2374_v36, %s2988_s11 }
0x14ad   :  { %v2377_v47 = vpop.permute.xlu0 %2376 }
0x14ae   :  { %v2379_v40 = vadd.f32 %v2377_v47, %v2369_v39 }
0x14b0   :  { %2983 = vtanh.f32 %v2379_v40 }
0x14b1   :  { %2985 = vtanh.f32 %v2361_v16 }
0x14ba   :  { %v2984_v44 = vpop.eup %2983 }
0x14bb   :  { %2382 = vrot.lane.b32.xlu1 %v2984_v44, %s2988_s11  ;;  %v2986_v4 = vpop.eup %2985 }
0x14bc   :  { %v2365_v48 = vmul.f32 0.5, %v2986_v4 }
0x14be   :  { %v2367_v53 = vadd.f32 0.5, %v2365_v48 }
0x14bf   :  { %2389 = vrot.lane.b32.xlu1 %v2202_v35, %s2988_s11 }
0x14c3   :  { %2396 = vrot.lane.b32.xlu1 %v2379_v40, %s2988_s11 }
0x152d   :  { %v2383_v54 = vpop.permute.xlu1 %2382 }
0x152e   :  { %v2385_v60 = vmul.f32 %v2383_v54, %v2367_v53 }
0x1530   :  { %2394 = vst.msk [vmem:[#allocation4] sm:$0x3] %vm32_vm0, %v2385_v60  ;;  %v2410_v1 = vmul.f32 %v2455_v59, %v2385_v60 }
0x1531   :  { %v2390_v2 = vpop.permute.xlu1 %2389 }
0x1532   :  { %2392 = vst.msk [vmem:[#allocation3 - $0x6] sm:$0xc0] %vm2386_vm2, %v2390_v2  ;;  %v2411_v34 = vsel %vm32_vm0, %v2410_v1, 0.0 }
0x1533   :  { %2412 = vadd.xlane.f32.xlu0 %v2411_v34 }
0x1535   :  { %v2397_v11 = vpop.permute.xlu1 %2396 }
0x1536   :  { %2399 = vst.msk [vmem:[#allocation5] sm:$0x3] %vm32_vm0, %v2397_v11 }
0x15c0   :  { %v2413_v45 = vpop.xlane.xlu0 %2412 }
0x15c1   :  { %v2421_v9 = vadd.f32 %v2456_v8, %v2413_v45 }
0x15c3   :  { %2423 = vst.msk [vmem:[%s3661_s7] sm:$0x3] %vm2422_vm3, %v2421_v9 }

</bundles_post_ra>
